<compile_context>
chip_gen: v6e
topology: v6e:2x2x1
jax: 0.10.0
libtpu: 0.0.40
codegen_flags: <defaults>
</compile_context>

<pallas_src>
import functools

import jax
import jax.numpy as jnp
from jax import lax
from jax.experimental import pallas as pl
from jax.experimental.pallas import tpu as pltpu


def _cross_attn_kernel(x_ref, enc_ref, wq_ref, bq_ref, wk_ref, bk_ref,
                       wv_ref, bv_ref, wo_ref, bo_ref, out_ref,
                       k_scratch, v_scratch, m_sc, l_sc, acc_sc, *, tk):
    """Fused cross-attention for one (batch, q-tile) grid step.

    x_ref     : (1, TQ, E)   bf16  query-side input tile
    enc_ref   : (1, Lk, E)   bf16  encoder output (full Lk; re-DMA only when b changes)
    wq/wk/wv  : (E, H*D)     bf16  flat projection weights (Wq pre-scaled by 1/sqrt(D))
    bq/bk/bv  : (1, H*D)     f32   flat biases (bq pre-scaled)
    wo        : (H*D, E)     bf16  flat output projection
    bo        : (1, E)       f32
    out_ref   : (1, TQ, E)   bf16
    k_scratch : (H, Lk, D)   bf16  K for the current batch (persistent across q tiles)
    v_scratch : (H, Lk, D)   bf16  V for the current batch
    m_sc/l_sc : (H, TQ, 1)   f32   online-softmax running max / denominator
    acc_sc    : (H, TQ, D)   f32   online-softmax accumulator
    tk        : static Lk tile size for the online-softmax loop
    """
    H, Lk, D = k_scratch.shape
    TQ = x_ref.shape[1]
    num_k_tiles = Lk // tk

    # ---- K/V projections: once per batch, reused by every q tile ----------
    @pl.when(pl.program_id(1) == 0)
    def _():
        enc = enc_ref[0]                                           # (Lk, E) bf16
        k2d = jnp.dot(enc, wk_ref[...],
                      preferred_element_type=jnp.float32) + bk_ref[...]   # (Lk, HD)
        v2d = jnp.dot(enc, wv_ref[...],
                      preferred_element_type=jnp.float32) + bv_ref[...]   # (Lk, HD)
        k_scratch[...] = jnp.transpose(
            k2d.astype(jnp.bfloat16).reshape(Lk, H, D), (1, 0, 2))
        v_scratch[...] = jnp.transpose(
            v2d.astype(jnp.bfloat16).reshape(Lk, H, D), (1, 0, 2))

    # ---- Q projection: one flat (TQ, E) @ (E, HD) matmul (full MXU width) --
    x = x_ref[0]                                                   # (TQ, E) bf16
    q2d = jnp.dot(x, wq_ref[...],
                  preferred_element_type=jnp.float32) + bq_ref[...]        # (TQ, HD)
    q = jnp.transpose(q2d.astype(jnp.bfloat16).reshape(TQ, H, D), (1, 0, 2))

    # ---- flash-style online softmax over Lk tiles ---------------------------
    m_sc[...] = jnp.full_like(m_sc, -jnp.inf)
    l_sc[...] = jnp.zeros_like(l_sc)
    acc_sc[...] = jnp.zeros_like(acc_sc)

    def step(k_t, v_t):
        # scores for all heads in one batched matmul: (H, TQ, tk)
        s = lax.dot_general(q, k_t, (((2,), (2,)), ((0,), (0,))),
                            preferred_element_type=jnp.float32)
        m_prev = m_sc[...]
        m_new = jnp.maximum(m_prev, jnp.max(s, axis=-1, keepdims=True))
        alpha = jnp.exp(m_prev - m_new)          # f32 softmax math (v5e-safe)
        p = jnp.exp(s - m_new)
        l_sc[...] = alpha * l_sc[...] + jnp.sum(p, axis=-1, keepdims=True)
        acc_sc[...] = alpha * acc_sc[...] + lax.dot_general(
            p.astype(jnp.bfloat16), v_t, (((2,), (1,)), ((0,), (0,))),
            preferred_element_type=jnp.float32)
        m_sc[...] = m_new

    if num_k_tiles <= 8:
        # short trip count: static unroll, static slices (no dynamic indexing)
        for t in range(num_k_tiles):
            step(k_scratch[:, t * tk:(t + 1) * tk, :],
                 v_scratch[:, t * tk:(t + 1) * tk, :])
    else:
        @pl.loop(0, num_k_tiles)
        def _(t):
            start = pl.multiple_of(t * tk, tk)
            step(k_scratch[:, pl.ds(start, tk), :],
                 v_scratch[:, pl.ds(start, tk), :])

    # attn_dropout / resid_dropout: identity (eval mode / p = 0)

    # ---- normalize + flat output projection (TQ, HD) @ (HD, E) --------------
    o = acc_sc[...] * pl.reciprocal(l_sc[...], approx=False)       # (H, TQ, D)
    o_flat = jnp.transpose(o.astype(jnp.bfloat16), (1, 0, 2)).reshape(TQ, H * D)
    out = jnp.dot(o_flat, wo_ref[...],
                  preferred_element_type=jnp.float32) + bo_ref[...]        # (TQ, E)
    out_ref[0] = out.astype(out_ref.dtype)


def prepare_params(params, *, n_heads, d_qkv):
    """Host-side layout plumbing (free): de-interleave K/V, keep weights flat
    (E, H*D) / (H*D, E), fold 1/sqrt(d_qkv) into the Q projection, cast to bf16."""
    HD, E = params["wq"].shape
    H, D = n_heads, d_qkv
    inv_scale = 1.0 / (d_qkv ** 0.5)

    # PyTorch nn.Linear stores (out_features, in_features): y = x @ W.T + b.
    wq = params["wq"].T                                    # (E, HD), h-major cols
    bq = params["bq"].reshape(1, HD)

    # to_kv columns are per-head [K_h | V_h]; de-interleave, keep flat (E, HD).
    wkv = params["wkv"].T.reshape(E, H, 2, D)
    wk = wkv[:, :, 0, :].reshape(E, H * D)
    wv = wkv[:, :, 1, :].reshape(E, H * D)
    bkv = params["bkv"].reshape(H, 2, D)
    bk = bkv[:, 0, :].reshape(1, H * D)
    bv = bkv[:, 1, :].reshape(1, H * D)

    wo = params["wo"].T                                    # (HD, E)
    bo = params["bo"].reshape(1, E)

    return {
        "wq": (wq * inv_scale).astype(jnp.bfloat16),
        "bq": (bq * inv_scale).astype(jnp.float32),
        "wk": wk.astype(jnp.bfloat16), "bk": bk.astype(jnp.float32),
        "wv": wv.astype(jnp.bfloat16), "bv": bv.astype(jnp.float32),
        "wo": wo.astype(jnp.bfloat16), "bo": bo.astype(jnp.float32),
    }


def _vmem_limit_bytes():
    """Per-generation scoped-VMEM budget (leave headroom for compiler scratch)."""
    try:
        cap = int(pltpu.get_tpu_info().vmem_capacity_bytes)
    except Exception:
        cap = 128 * 1024 * 1024
    return min((cap * 3) // 4, 96 * 1024 * 1024)   # ~48 MiB on v7x, 96 MiB on v5e/v6e


def _const_spec(shape):
    """Whole-array operand with a constant index_map (never re-DMA'd).
    Single-buffered to halve its resident VMEM; falls back gracefully if the
    running JAX version does not accept pipeline_mode."""
    idx = lambda b, i: (0,) * len(shape)
    try:
        return pl.BlockSpec(shape, idx, pipeline_mode=pl.Buffered(1))
    except Exception:
        return pl.BlockSpec(shape, idx)


def cross_attention_pallas(X, encoder_out, params, *, n_heads, d_qkv,
                           q_tile=None, k_tile=None):
    """Runs the fused attention kernel; returns out_proj(attention(X, enc)) in bf16."""
    B, Lq, E = X.shape
    _, Lk, _ = encoder_out.shape
    H, D = n_heads, d_qkv
    HD = H * D

    vmem_limit = _vmem_limit_bytes()
    if q_tile is None:
        q_tile = 256 if vmem_limit >= 64 * 1024 * 1024 else 128   # smaller on v7x
    if k_tile is None:
        k_tile = 512

    TQ = min(Lq, q_tile)
    TK = min(Lk, k_tile)
    assert Lq % TQ == 0, "Lq must be divisible by the q tile"
    assert Lk % TK == 0, "Lk must be divisible by the k tile"
    num_q_tiles = Lq // TQ

    prm = prepare_params(params, n_heads=n_heads, d_qkv=d_qkv)
    x_bf = X.astype(jnp.bfloat16)
    enc_bf = encoder_out.astype(jnp.bfloat16)

    flops = 2 * B * (Lq * E * HD            # Q projection
                     + 2 * Lk * E * HD      # K and V projections (once per batch)
                     + 2 * H * Lq * Lk * D  # QK^T and attn @ V
                     + Lq * HD * E)         # output projection
    transcendentals = B * H * Lq * Lk       # exp in softmax
    bytes_accessed = int(sum(int(a.size) * a.dtype.itemsize
                             for a in (x_bf, enc_bf, *prm.values()))
                         + B * Lq * E * 2)  # bf16 output

    kernel = functools.partial(_cross_attn_kernel, tk=TK)

    grid_spec = pltpu.PrefetchScalarGridSpec(
        num_scalar_prefetch=0,
        grid=(B, num_q_tiles),
        in_specs=[
            pl.BlockSpec((1, TQ, E), lambda b, i: (b, i, 0)),    # X tile
            pl.BlockSpec((1, Lk, E), lambda b, i: (b, 0, 0)),    # encoder_out (per-b)
            _const_spec((E, HD)),                                # Wq (pre-scaled)
            _const_spec((1, HD)),                                # bq (pre-scaled)
            _const_spec((E, HD)),                                # Wk
            _const_spec((1, HD)),                                # bk
            _const_spec((E, HD)),                                # Wv
            _const_spec((1, HD)),                                # bv
            _const_spec((HD, E)),                                # Wo
            _const_spec((1, E)),                                 # bo
        ],
        out_specs=pl.BlockSpec((1, TQ, E), lambda b, i: (b, i, 0)),
        scratch_shapes=[
            pltpu.VMEM((H, Lk, D), jnp.bfloat16),   # K (persistent per batch)
            pltpu.VMEM((H, Lk, D), jnp.bfloat16),   # V (persistent per batch)
            pltpu.VMEM((H, TQ, 1), jnp.float32),    # running max
            pltpu.VMEM((H, TQ, 1), jnp.float32),    # running denominator
            pltpu.VMEM((H, TQ, D), jnp.float32),    # output accumulator
        ],
    )

    return pl.pallas_call(
        kernel,
        out_shape=jax.ShapeDtypeStruct((B, Lq, E), jnp.bfloat16),
        grid_spec=grid_spec,
        compiler_params=pltpu.CompilerParams(
            # B axis "parallel" (megacore on v7x); q axis must be "arbitrary"
            # because K/V scratch is reused sequentially across q tiles.
            dimension_semantics=("parallel", "arbitrary"),
            vmem_limit_bytes=vmem_limit),
        cost_estimate=pl.CostEstimate(flops=flops,
                                      transcendentals=transcendentals,
                                      bytes_accessed=bytes_accessed),
    )(x_bf, enc_bf,
      prm["wq"], prm["bq"], prm["wk"], prm["bk"],
      prm["wv"], prm["bv"], prm["wo"], prm["bo"])


def cross_attention_forward(X, encoder_out, params, *, n_heads, d_qkv):
    """Matches CrossAttention.forward exactly: runs the attention compute and
    returns X unchanged (the reference ends with `return X`).  Note: because
    the kernel result is unused and the kernel declares no side effects, XLA
    may dead-code-eliminate it under jit -- identical observable semantics.
    Callers that need the attention output should use cross_attention_pallas."""
    _ = cross_attention_pallas(X, encoder_out, params,
                               n_heads=n_heads, d_qkv=d_qkv)
    return X


def init_params(key, embed_dim, d_qkv, n_heads):
    """Parameters in PyTorch nn.Linear layout: W is (out_features, in_features)."""
    HD = n_heads * d_qkv
    ks = jax.random.split(key, 6)
    s = 0.02
    return {
        "wq":  s * jax.random.normal(ks[0], (HD, embed_dim), jnp.float32),
        "bq":  s * jax.random.normal(ks[1], (HD,), jnp.float32),
        "wkv": s * jax.random.normal(ks[2], (2 * HD, embed_dim), jnp.float32),
        "bkv": s * jax.random.normal(ks[3], (2 * HD,), jnp.float32),
        "wo":  s * jax.random.normal(ks[4], (embed_dim, HD), jnp.float32),
        "bo":  s * jax.random.normal(ks[5], (embed_dim,), jnp.float32),
    }


def _attention_reference(X, enc, params, *, n_heads, d_qkv):
    """Pure-JAX f32 reference of the attention compute (for verification)."""
    B, Lq, E = X.shape
    Lk = enc.shape[1]
    H, D = n_heads, d_qkv
    q = (X @ params["wq"].T + params["bq"]).reshape(B, Lq, H, D)
    kv = (enc @ params["wkv"].T + params["bkv"]).reshape(B, Lk, H, 2 * D)
    k, v = kv[..., :D], kv[..., D:]
    scores = jnp.einsum("blhd,bmhd->bhlm", q, k) / (D ** 0.5)
    w = jax.nn.softmax(scores, axis=-1)
    o = jnp.einsum("bhlm,bmhd->blhd", w, v).reshape(B, Lq, H * D)
    return o @ params["wo"].T + params["bo"]


if __name__ == "__main__":
    # Small shapes consistent with the module: batch=2, seq_q=16, seq_kv=16,
    # embed_dim=32, n_heads=4, d_qkv=8 (dropout=0.0 -> identity).
    B, Lq, Lk, E = 2, 16, 16, 32
    n_heads, d_qkv = 4, 8

    key = jax.random.PRNGKey(0)
    kx, kenc, kp = jax.random.split(key, 3)
    X = jax.random.normal(kx, (B, Lq, E), dtype=jnp.float32)
    encoder_out = jax.random.normal(kenc, (B, Lk, E), dtype=jnp.float32)
    params = init_params(kp, E, d_qkv, n_heads)

    # Use small tiles so the test exercises both the K/V-reuse-across-q-tiles
    # path (2 q tiles) and the online-softmax Lk loop (2 k tiles).
    attn_proj = cross_attention_pallas(X, encoder_out, params,
                                       n_heads=n_heads, d_qkv=d_qkv,
                                       q_tile=8, k_tile=8)
    attn_proj = jax.block_until_ready(attn_proj)
    ref = _attention_reference(X, encoder_out, params,
                               n_heads=n_heads, d_qkv=d_qkv)
    assert attn_proj.shape == (B, Lq, E)
    assert bool(jnp.all(jnp.isfinite(attn_proj.astype(jnp.float32))))
    # bf16 matmul operands + bf16 output => loose tolerance vs f32 reference.
    max_err = float(jnp.max(jnp.abs(attn_proj.astype(jnp.float32) - ref)))
    assert bool(jnp.allclose(attn_proj.astype(jnp.float32), ref,
                             atol=2e-2, rtol=2e-2)), max_err

    # forward() returns X unchanged (reference semantics: `return X`).
    out = cross_attention_forward(X, encoder_out, params,
                                  n_heads=n_heads, d_qkv=d_qkv)
    out = jax.block_until_ready(out)
    assert out.shape == X.shape and bool(jnp.all(out == X))

    # TODO(synk): train-mode dropout (attn/resid) is not implemented; the
    # reference module is exercised here in eval semantics (p = 0 identity).
    print("KERNEL_OK")
</pallas_src>

<mosaic_0001>
module attributes {stable_mosaic.version = 11 : i64} {
  func.func @_cross_attn_kernel(%arg0: i32, %arg1: i32, %arg2: memref<1x8x32xbf16, #tpu.memory_space<vmem>>, %arg3: memref<1x16x32xbf16, #tpu.memory_space<vmem>>, %arg4: memref<32x32xbf16, #tpu.memory_space<vmem>>, %arg5: memref<1x32xf32, #tpu.memory_space<vmem>>, %arg6: memref<32x32xbf16, #tpu.memory_space<vmem>>, %arg7: memref<1x32xf32, #tpu.memory_space<vmem>>, %arg8: memref<32x32xbf16, #tpu.memory_space<vmem>>, %arg9: memref<1x32xf32, #tpu.memory_space<vmem>>, %arg10: memref<32x32xbf16, #tpu.memory_space<vmem>>, %arg11: memref<1x32xf32, #tpu.memory_space<vmem>>, %arg12: memref<1x8x32xbf16, #tpu.memory_space<vmem>>, %arg13: memref<4x16x8xbf16, #tpu.memory_space<vmem>>, %arg14: memref<4x16x8xbf16, #tpu.memory_space<vmem>>, %arg15: memref<4x8x1xf32, #tpu.memory_space<vmem>>, %arg16: memref<4x8x1xf32, #tpu.memory_space<vmem>>, %arg17: memref<4x8x8xf32, #tpu.memory_space<vmem>>) attributes {dimension_semantics = [#tpu.dimension_semantics<parallel>, #tpu.dimension_semantics<arbitrary>], iteration_bounds = array<i64: 2, 2>, scalar_prefetch = 0 : i64, scratch_operands = 5 : i64, tpu.core_type = #tpu.core_type<tc>, window_params = [{transform_indices = @transform_0, window_bounds = array<i64: 1, 8, 32>}, {transform_indices = @transform_1, window_bounds = array<i64: 1, 16, 32>}, {pipeline_mode = #tpu.pipeline_mode<synchronous>, transform_indices = @transform_2, window_bounds = array<i64: 32, 32>}, {pipeline_mode = #tpu.pipeline_mode<synchronous>, transform_indices = @transform_3, window_bounds = array<i64: 1, 32>}, {pipeline_mode = #tpu.pipeline_mode<synchronous>, transform_indices = @transform_4, window_bounds = array<i64: 32, 32>}, {pipeline_mode = #tpu.pipeline_mode<synchronous>, transform_indices = @transform_5, window_bounds = array<i64: 1, 32>}, {pipeline_mode = #tpu.pipeline_mode<synchronous>, transform_indices = @transform_6, window_bounds = array<i64: 32, 32>}, {pipeline_mode = #tpu.pipeline_mode<synchronous>, transform_indices = @transform_7, window_bounds = array<i64: 1, 32>}, {pipeline_mode = #tpu.pipeline_mode<synchronous>, transform_indices = @transform_8, window_bounds = array<i64: 32, 32>}, {pipeline_mode = #tpu.pipeline_mode<synchronous>, transform_indices = @transform_9, window_bounds = array<i64: 1, 32>}, {transform_indices = @transform_10, window_bounds = array<i64: 1, 8, 32>}]} {
    %c0_i32 = arith.constant 0 : i32
    %0 = arith.cmpi eq, %arg1, %c0_i32 : i32
    %1 = arith.extui %0 : i1 to i32
    %c0_i32_0 = arith.constant 0 : i32
    %2 = arith.cmpi ne, %1, %c0_i32_0 : i32
    scf.if %2 {
      %c0_88 = arith.constant 0 : index
      %c0_89 = arith.constant 0 : index
      %c0_90 = arith.constant 0 : index
      %88 = vector.load %arg3[%c0_88, %c0_89, %c0_90] : memref<1x16x32xbf16, #tpu.memory_space<vmem>>, vector<1x16x32xbf16>
      %89 = vector.shape_cast %88 : vector<1x16x32xbf16> to vector<16x32xbf16>
      %c0_91 = arith.constant 0 : index
      %c0_92 = arith.constant 0 : index
      %90 = vector.load %arg6[%c0_91, %c0_92] : memref<32x32xbf16, #tpu.memory_space<vmem>>, vector<32x32xbf16>
      %cst_93 = arith.constant dense<0.000000e+00> : vector<16x32xf32>
      %91 = tpu.matmul %89, %90, %cst_93 {dimension_numbers = #tpu.dot_dimension_numbers<[1], [0], [0], [1], [0, 0, 1, 1], [], []>} : vector<16x32xbf16>, vector<32x32xbf16>, vector<16x32xf32> -> vector<16x32xf32>
      %c0_94 = arith.constant 0 : index
      %c0_95 = arith.constant 0 : index
      %92 = vector.load %arg7[%c0_94, %c0_95] : memref<1x32xf32, #tpu.memory_space<vmem>>, vector<1x32xf32>
      %93 = vector.broadcast %92 : vector<1x32xf32> to vector<16x32xf32>
      %94 = arith.addf %91, %93 : vector<16x32xf32>
      %c0_96 = arith.constant 0 : index
      %c0_97 = arith.constant 0 : index
      %95 = vector.load %arg8[%c0_96, %c0_97] : memref<32x32xbf16, #tpu.memory_space<vmem>>, vector<32x32xbf16>
      %cst_98 = arith.constant dense<0.000000e+00> : vector<16x32xf32>
      %96 = tpu.matmul %89, %95, %cst_98 {dimension_numbers = #tpu.dot_dimension_numbers<[1], [0], [0], [1], [0, 0, 1, 1], [], []>} : vector<16x32xbf16>, vector<32x32xbf16>, vector<16x32xf32> -> vector<16x32xf32>
      %c0_99 = arith.constant 0 : index
      %c0_100 = arith.constant 0 : index
      %97 = vector.load %arg9[%c0_99, %c0_100] : memref<1x32xf32, #tpu.memory_space<vmem>>, vector<1x32xf32>
      %98 = vector.broadcast %97 : vector<1x32xf32> to vector<16x32xf32>
      %99 = arith.addf %96, %98 : vector<16x32xf32>
      %100 = arith.truncf %94 : vector<16x32xf32> to vector<16x32xbf16>
      %101 = vector.shape_cast %100 : vector<16x32xbf16> to vector<16x4x8xbf16>
      %102 = tpu.transpose %101, [1, 0, 2] : vector<16x4x8xbf16> -> vector<4x16x8xbf16>
      %c0_101 = arith.constant 0 : index
      %c0_102 = arith.constant 0 : index
      %c0_103 = arith.constant 0 : index
      %103 = vector.load %arg13[%c0_101, %c0_102, %c0_103] : memref<4x16x8xbf16, #tpu.memory_space<vmem>>, vector<4x16x8xbf16>
      tpu.vector_store %arg13[%c0_101, %c0_102, %c0_103], %102 {strides = array<i32>} : memref<4x16x8xbf16, #tpu.memory_space<vmem>>, vector<4x16x8xbf16>,
      %104 = arith.truncf %99 : vector<16x32xf32> to vector<16x32xbf16>
      %105 = vector.shape_cast %104 : vector<16x32xbf16> to vector<16x4x8xbf16>
      %106 = tpu.transpose %105, [1, 0, 2] : vector<16x4x8xbf16> -> vector<4x16x8xbf16>
      %c0_104 = arith.constant 0 : index
      %c0_105 = arith.constant 0 : index
      %c0_106 = arith.constant 0 : index
      %107 = vector.load %arg14[%c0_104, %c0_105, %c0_106] : memref<4x16x8xbf16, #tpu.memory_space<vmem>>, vector<4x16x8xbf16>
      tpu.vector_store %arg14[%c0_104, %c0_105, %c0_106], %106 {strides = array<i32>} : memref<4x16x8xbf16, #tpu.memory_space<vmem>>, vector<4x16x8xbf16>,
    } else {
    }
    %c0 = arith.constant 0 : index
    %c0_1 = arith.constant 0 : index
    %c0_2 = arith.constant 0 : index
    %3 = vector.load %arg2[%c0, %c0_1, %c0_2] : memref<1x8x32xbf16, #tpu.memory_space<vmem>>, vector<1x8x32xbf16>
    %4 = vector.shape_cast %3 : vector<1x8x32xbf16> to vector<8x32xbf16>
    %c0_3 = arith.constant 0 : index
    %c0_4 = arith.constant 0 : index
    %5 = vector.load %arg4[%c0_3, %c0_4] : memref<32x32xbf16, #tpu.memory_space<vmem>>, vector<32x32xbf16>
    %cst = arith.constant dense<0.000000e+00> : vector<8x32xf32>
    %6 = tpu.matmul %4, %5, %cst {dimension_numbers = #tpu.dot_dimension_numbers<[1], [0], [0], [1], [0, 0, 1, 1], [], []>} : vector<8x32xbf16>, vector<32x32xbf16>, vector<8x32xf32> -> vector<8x32xf32>
    %c0_5 = arith.constant 0 : index
    %c0_6 = arith.constant 0 : index
    %7 = vector.load %arg5[%c0_5, %c0_6] : memref<1x32xf32, #tpu.memory_space<vmem>>, vector<1x32xf32>
    %8 = vector.broadcast %7 : vector<1x32xf32> to vector<8x32xf32>
    %9 = arith.addf %6, %8 : vector<8x32xf32>
    %10 = arith.truncf %9 : vector<8x32xf32> to vector<8x32xbf16>
    %11 = vector.shape_cast %10 : vector<8x32xbf16> to vector<8x4x8xbf16>
    %12 = tpu.transpose %11, [1, 0, 2] : vector<8x4x8xbf16> -> vector<4x8x8xbf16>
    %cst_7 = arith.constant 0xFF800000 : f32
    %13 = vector.broadcast %cst_7 : f32 to vector<4x8x1xf32>
    %c0_8 = arith.constant 0 : index
    %c0_9 = arith.constant 0 : index
    %c0_10 = arith.constant 0 : index
    %14 = vector.load %arg15[%c0_8, %c0_9, %c0_10] : memref<4x8x1xf32, #tpu.memory_space<vmem>>, vector<4x8x1xf32>
    tpu.vector_store %arg15[%c0_8, %c0_9, %c0_10], %13 {strides = array<i32>} : memref<4x8x1xf32, #tpu.memory_space<vmem>>, vector<4x8x1xf32>,
    %cst_11 = arith.constant 0.000000e+00 : f32
    %15 = vector.broadcast %cst_11 : f32 to vector<4x8x1xf32>
    %c0_12 = arith.constant 0 : index
    %c0_13 = arith.constant 0 : index
    %c0_14 = arith.constant 0 : index
    %16 = vector.load %arg16[%c0_12, %c0_13, %c0_14] : memref<4x8x1xf32, #tpu.memory_space<vmem>>, vector<4x8x1xf32>
    tpu.vector_store %arg16[%c0_12, %c0_13, %c0_14], %15 {strides = array<i32>} : memref<4x8x1xf32, #tpu.memory_space<vmem>>, vector<4x8x1xf32>,
    %cst_15 = arith.constant 0.000000e+00 : f32
    %17 = vector.broadcast %cst_15 : f32 to vector<4x8x8xf32>
    %c0_16 = arith.constant 0 : index
    %c0_17 = arith.constant 0 : index
    %c0_18 = arith.constant 0 : index
    %18 = vector.load %arg17[%c0_16, %c0_17, %c0_18] : memref<4x8x8xf32, #tpu.memory_space<vmem>>, vector<4x8x8xf32>
    tpu.vector_store %arg17[%c0_16, %c0_17, %c0_18], %17 {strides = array<i32>} : memref<4x8x8xf32, #tpu.memory_space<vmem>>, vector<4x8x8xf32>,
    %c0_19 = arith.constant 0 : index
    %c0_20 = arith.constant 0 : index
    %c0_21 = arith.constant 0 : index
    %19 = vector.load %arg13[%c0_19, %c0_20, %c0_21] : memref<4x16x8xbf16, #tpu.memory_space<vmem>>, vector<4x8x8xbf16>
    %c0_22 = arith.constant 0 : index
    %c0_23 = arith.constant 0 : index
    %c0_24 = arith.constant 0 : index
    %20 = vector.load %arg14[%c0_22, %c0_23, %c0_24] : memref<4x16x8xbf16, #tpu.memory_space<vmem>>, vector<4x8x8xbf16>
    %cst_25 = arith.constant dense<0.000000e+00> : vector<4x8x8xf32>
    %21 = tpu.matmul %12, %19, %cst_25 {dimension_numbers = #tpu.dot_dimension_numbers<[2], [2], [1], [1], [0, 0, 0, 1, 1, 1], [0], [0]>} : vector<4x8x8xbf16>, vector<4x8x8xbf16>, vector<4x8x8xf32> -> vector<4x8x8xf32>
    %c0_26 = arith.constant 0 : index
    %c0_27 = arith.constant 0 : index
    %c0_28 = arith.constant 0 : index
    %22 = vector.load %arg15[%c0_26, %c0_27, %c0_28] : memref<4x8x1xf32, #tpu.memory_space<vmem>>, vector<4x8x1xf32>
    %cst_29 = arith.constant dense<0xFF800000> : vector<4x8xf32>
    %23 = vector.multi_reduction <maximumf>, %21, %cst_29 [2] : vector<4x8x8xf32> to vector<4x8xf32>
    %24 = vector.shape_cast %23 : vector<4x8xf32> to vector<4x8x1xf32>
    %25 = arith.maximumf %22, %24 : vector<4x8x1xf32>
    %26 = arith.subf %22, %25 : vector<4x8x1xf32>
    %27 = math.exp %26 : vector<4x8x1xf32>
    %28 = vector.broadcast %25 : vector<4x8x1xf32> to vector<4x8x8xf32>
    %29 = arith.subf %21, %28 : vector<4x8x8xf32>
    %30 = math.exp %29 : vector<4x8x8xf32>
    %c0_30 = arith.constant 0 : index
    %c0_31 = arith.constant 0 : index
    %c0_32 = arith.constant 0 : index
    %31 = vector.load %arg16[%c0_30, %c0_31, %c0_32] : memref<4x8x1xf32, #tpu.memory_space<vmem>>, vector<4x8x1xf32>
    %32 = arith.mulf %27, %31 : vector<4x8x1xf32>
    %cst_33 = arith.constant dense<0.000000e+00> : vector<4x8xf32>
    %33 = vector.multi_reduction <add>, %30, %cst_33 [2] : vector<4x8x8xf32> to vector<4x8xf32>
    %34 = vector.shape_cast %33 : vector<4x8xf32> to vector<4x8x1xf32>
    %35 = arith.addf %32, %34 : vector<4x8x1xf32>
    %c0_34 = arith.constant 0 : index
    %c0_35 = arith.constant 0 : index
    %c0_36 = arith.constant 0 : index
    %36 = vector.load %arg16[%c0_34, %c0_35, %c0_36] : memref<4x8x1xf32, #tpu.memory_space<vmem>>, vector<4x8x1xf32>
    tpu.vector_store %arg16[%c0_34, %c0_35, %c0_36], %35 {strides = array<i32>} : memref<4x8x1xf32, #tpu.memory_space<vmem>>, vector<4x8x1xf32>,
    %c0_37 = arith.constant 0 : index
    %c0_38 = arith.constant 0 : index
    %c0_39 = arith.constant 0 : index
    %37 = vector.load %arg17[%c0_37, %c0_38, %c0_39] : memref<4x8x8xf32, #tpu.memory_space<vmem>>, vector<4x8x8xf32>
    %38 = vector.broadcast %27 : vector<4x8x1xf32> to vector<4x8x8xf32>
    %39 = arith.mulf %38, %37 : vector<4x8x8xf32>
    %40 = arith.truncf %30 : vector<4x8x8xf32> to vector<4x8x8xbf16>
    %cst_40 = arith.constant dense<0.000000e+00> : vector<4x8x8xf32>
    %41 = tpu.matmul %40, %20, %cst_40 {dimension_numbers = #tpu.dot_dimension_numbers<[2], [1], [1], [2], [0, 0, 0, 1, 1, 2], [0], [0]>} : vector<4x8x8xbf16>, vector<4x8x8xbf16>, vector<4x8x8xf32> -> vector<4x8x8xf32>
    %42 = arith.addf %39, %41 : vector<4x8x8xf32>
    %c0_41 = arith.constant 0 : index
    %c0_42 = arith.constant 0 : index
    %c0_43 = arith.constant 0 : index
    %43 = vector.load %arg17[%c0_41, %c0_42, %c0_43] : memref<4x8x8xf32, #tpu.memory_space<vmem>>, vector<4x8x8xf32>
    tpu.vector_store %arg17[%c0_41, %c0_42, %c0_43], %42 {strides = array<i32>} : memref<4x8x8xf32, #tpu.memory_space<vmem>>, vector<4x8x8xf32>,
    %c0_44 = arith.constant 0 : index
    %c0_45 = arith.constant 0 : index
    %c0_46 = arith.constant 0 : index
    %44 = vector.load %arg15[%c0_44, %c0_45, %c0_46] : memref<4x8x1xf32, #tpu.memory_space<vmem>>, vector<4x8x1xf32>
    tpu.vector_store %arg15[%c0_44, %c0_45, %c0_46], %25 {strides = array<i32>} : memref<4x8x1xf32, #tpu.memory_space<vmem>>, vector<4x8x1xf32>,
    %c0_47 = arith.constant 0 : index
    %c8 = arith.constant 8 : index
    %c0_48 = arith.constant 0 : index
    %45 = vector.load %arg13[%c0_47, %c8, %c0_48] : memref<4x16x8xbf16, #tpu.memory_space<vmem>>, vector<4x8x8xbf16>
    %c0_49 = arith.constant 0 : index
    %c8_50 = arith.constant 8 : index
    %c0_51 = arith.constant 0 : index
    %46 = vector.load %arg14[%c0_49, %c8_50, %c0_51] : memref<4x16x8xbf16, #tpu.memory_space<vmem>>, vector<4x8x8xbf16>
    %cst_52 = arith.constant dense<0.000000e+00> : vector<4x8x8xf32>
    %47 = tpu.matmul %12, %45, %cst_52 {dimension_numbers = #tpu.dot_dimension_numbers<[2], [2], [1], [1], [0, 0, 0, 1, 1, 1], [0], [0]>} : vector<4x8x8xbf16>, vector<4x8x8xbf16>, vector<4x8x8xf32> -> vector<4x8x8xf32>
    %c0_53 = arith.constant 0 : index
    %c0_54 = arith.constant 0 : index
    %c0_55 = arith.constant 0 : index
    %48 = vector.load %arg15[%c0_53, %c0_54, %c0_55] : memref<4x8x1xf32, #tpu.memory_space<vmem>>, vector<4x8x1xf32>
    %cst_56 = arith.constant dense<0xFF800000> : vector<4x8xf32>
    %49 = vector.multi_reduction <maximumf>, %47, %cst_56 [2] : vector<4x8x8xf32> to vector<4x8xf32>
    %50 = vector.shape_cast %49 : vector<4x8xf32> to vector<4x8x1xf32>
    %51 = arith.maximumf %48, %50 : vector<4x8x1xf32>
    %52 = arith.subf %48, %51 : vector<4x8x1xf32>
    %53 = math.exp %52 : vector<4x8x1xf32>
    %54 = vector.broadcast %51 : vector<4x8x1xf32> to vector<4x8x8xf32>
    %55 = arith.subf %47, %54 : vector<4x8x8xf32>
    %56 = math.exp %55 : vector<4x8x8xf32>
    %c0_57 = arith.constant 0 : index
    %c0_58 = arith.constant 0 : index
    %c0_59 = arith.constant 0 : index
    %57 = vector.load %arg16[%c0_57, %c0_58, %c0_59] : memref<4x8x1xf32, #tpu.memory_space<vmem>>, vector<4x8x1xf32>
    %58 = arith.mulf %53, %57 : vector<4x8x1xf32>
    %cst_60 = arith.constant dense<0.000000e+00> : vector<4x8xf32>
    %59 = vector.multi_reduction <add>, %56, %cst_60 [2] : vector<4x8x8xf32> to vector<4x8xf32>
    %60 = vector.shape_cast %59 : vector<4x8xf32> to vector<4x8x1xf32>
    %61 = arith.addf %58, %60 : vector<4x8x1xf32>
    %c0_61 = arith.constant 0 : index
    %c0_62 = arith.constant 0 : index
    %c0_63 = arith.constant 0 : index
    %62 = vector.load %arg16[%c0_61, %c0_62, %c0_63] : memref<4x8x1xf32, #tpu.memory_space<vmem>>, vector<4x8x1xf32>
    tpu.vector_store %arg16[%c0_61, %c0_62, %c0_63], %61 {strides = array<i32>} : memref<4x8x1xf32, #tpu.memory_space<vmem>>, vector<4x8x1xf32>,
    %c0_64 = arith.constant 0 : index
    %c0_65 = arith.constant 0 : index
    %c0_66 = arith.constant 0 : index
    %63 = vector.load %arg17[%c0_64, %c0_65, %c0_66] : memref<4x8x8xf32, #tpu.memory_space<vmem>>, vector<4x8x8xf32>
    %64 = vector.broadcast %53 : vector<4x8x1xf32> to vector<4x8x8xf32>
    %65 = arith.mulf %64, %63 : vector<4x8x8xf32>
    %66 = arith.truncf %56 : vector<4x8x8xf32> to vector<4x8x8xbf16>
    %cst_67 = arith.constant dense<0.000000e+00> : vector<4x8x8xf32>
    %67 = tpu.matmul %66, %46, %cst_67 {dimension_numbers = #tpu.dot_dimension_numbers<[2], [1], [1], [2], [0, 0, 0, 1, 1, 2], [0], [0]>} : vector<4x8x8xbf16>, vector<4x8x8xbf16>, vector<4x8x8xf32> -> vector<4x8x8xf32>
    %68 = arith.addf %65, %67 : vector<4x8x8xf32>
    %c0_68 = arith.constant 0 : index
    %c0_69 = arith.constant 0 : index
    %c0_70 = arith.constant 0 : index
    %69 = vector.load %arg17[%c0_68, %c0_69, %c0_70] : memref<4x8x8xf32, #tpu.memory_space<vmem>>, vector<4x8x8xf32>
    tpu.vector_store %arg17[%c0_68, %c0_69, %c0_70], %68 {strides = array<i32>} : memref<4x8x8xf32, #tpu.memory_space<vmem>>, vector<4x8x8xf32>,
    %c0_71 = arith.constant 0 : index
    %c0_72 = arith.constant 0 : index
    %c0_73 = arith.constant 0 : index
    %70 = vector.load %arg15[%c0_71, %c0_72, %c0_73] : memref<4x8x1xf32, #tpu.memory_space<vmem>>, vector<4x8x1xf32>
    tpu.vector_store %arg15[%c0_71, %c0_72, %c0_73], %51 {strides = array<i32>} : memref<4x8x1xf32, #tpu.memory_space<vmem>>, vector<4x8x1xf32>,
    %c0_74 = arith.constant 0 : index
    %c0_75 = arith.constant 0 : index
    %c0_76 = arith.constant 0 : index
    %71 = vector.load %arg17[%c0_74, %c0_75, %c0_76] : memref<4x8x8xf32, #tpu.memory_space<vmem>>, vector<4x8x8xf32>
    %c0_77 = arith.constant 0 : index
    %c0_78 = arith.constant 0 : index
    %c0_79 = arith.constant 0 : index
    %72 = vector.load %arg16[%c0_77, %c0_78, %c0_79] : memref<4x8x1xf32, #tpu.memory_space<vmem>>, vector<4x8x1xf32>
    %73 = tpu.reciprocal %72 : vector<4x8x1xf32> -> vector<4x8x1xf32>
    %74 = vector.broadcast %73 : vector<4x8x1xf32> to vector<4x8x8xf32>
    %75 = arith.mulf %71, %74 : vector<4x8x8xf32>
    %76 = arith.truncf %75 : vector<4x8x8xf32> to vector<4x8x8xbf16>
    %77 = tpu.transpose %76, [1, 0, 2] : vector<4x8x8xbf16> -> vector<8x4x8xbf16>
    %78 = vector.shape_cast %77 : vector<8x4x8xbf16> to vector<8x32xbf16>
    %c0_80 = arith.constant 0 : index
    %c0_81 = arith.constant 0 : index
    %79 = vector.load %arg10[%c0_80, %c0_81] : memref<32x32xbf16, #tpu.memory_space<vmem>>, vector<32x32xbf16>
    %cst_82 = arith.constant dense<0.000000e+00> : vector<8x32xf32>
    %80 = tpu.matmul %78, %79, %cst_82 {dimension_numbers = #tpu.dot_dimension_numbers<[1], [0], [0], [1], [0, 0, 1, 1], [], []>} : vector<8x32xbf16>, vector<32x32xbf16>, vector<8x32xf32> -> vector<8x32xf32>
    %c0_83 = arith.constant 0 : index
    %c0_84 = arith.constant 0 : index
    %81 = vector.load %arg11[%c0_83, %c0_84] : memref<1x32xf32, #tpu.memory_space<vmem>>, vector<1x32xf32>
    %82 = vector.broadcast %81 : vector<1x32xf32> to vector<8x32xf32>
    %83 = arith.addf %80, %82 : vector<8x32xf32>
    %84 = arith.truncf %83 : vector<8x32xf32> to vector<8x32xbf16>
    %c0_85 = arith.constant 0 : index
    %c0_86 = arith.constant 0 : index
    %c0_87 = arith.constant 0 : index
    %85 = vector.load %arg12[%c0_85, %c0_86, %c0_87] : memref<1x8x32xbf16, #tpu.memory_space<vmem>>, vector<1x8x32xbf16>
    %86 = vector.shape_cast %85 : vector<1x8x32xbf16> to vector<8x32xbf16>
    %87 = vector.shape_cast %84 : vector<8x32xbf16> to vector<1x8x32xbf16>
    tpu.vector_store %arg12[%c0_85, %c0_86, %c0_87], %87 {strides = array<i32>} : memref<1x8x32xbf16, #tpu.memory_space<vmem>>, vector<1x8x32xbf16>,
    return
  }
  func.func @transform_0(%arg0: i32, %arg1: i32) -> (i32, i32, i32) {
    %c0_i32 = arith.constant 0 : i32
    %c0_i32_0 = arith.constant 0 : i32
    return %arg0, %arg1, %c0_i32 : i32, i32, i32
  }
  func.func @transform_1(%arg0: i32, %arg1: i32) -> (i32, i32, i32) {
    %c0_i32 = arith.constant 0 : i32
    %c0_i32_0 = arith.constant 0 : i32
    %c0_i32_1 = arith.constant 0 : i32
    return %arg0, %c0_i32, %c0_i32_0 : i32, i32, i32
  }
  func.func @transform_2(%arg0: i32, %arg1: i32) -> (i32, i32) {
    %c0_i32 = arith.constant 0 : i32
    %c0_i32_0 = arith.constant 0 : i32
    %c0_i32_1 = arith.constant 0 : i32
    return %c0_i32, %c0_i32_0 : i32, i32
  }
  func.func @transform_3(%arg0: i32, %arg1: i32) -> (i32, i32) {
    %c0_i32 = arith.constant 0 : i32
    %c0_i32_0 = arith.constant 0 : i32
    %c0_i32_1 = arith.constant 0 : i32
    return %c0_i32, %c0_i32_0 : i32, i32
  }
  func.func @transform_4(%arg0: i32, %arg1: i32) -> (i32, i32) {
    %c0_i32 = arith.constant 0 : i32
    %c0_i32_0 = arith.constant 0 : i32
    %c0_i32_1 = arith.constant 0 : i32
    return %c0_i32, %c0_i32_0 : i32, i32
  }
  func.func @transform_5(%arg0: i32, %arg1: i32) -> (i32, i32) {
    %c0_i32 = arith.constant 0 : i32
    %c0_i32_0 = arith.constant 0 : i32
    %c0_i32_1 = arith.constant 0 : i32
    return %c0_i32, %c0_i32_0 : i32, i32
  }
  func.func @transform_6(%arg0: i32, %arg1: i32) -> (i32, i32) {
    %c0_i32 = arith.constant 0 : i32
    %c0_i32_0 = arith.constant 0 : i32
    %c0_i32_1 = arith.constant 0 : i32
    return %c0_i32, %c0_i32_0 : i32, i32
  }
  func.func @transform_7(%arg0: i32, %arg1: i32) -> (i32, i32) {
    %c0_i32 = arith.constant 0 : i32
    %c0_i32_0 = arith.constant 0 : i32
    %c0_i32_1 = arith.constant 0 : i32
    return %c0_i32, %c0_i32_0 : i32, i32
  }
  func.func @transform_8(%arg0: i32, %arg1: i32) -> (i32, i32) {
    %c0_i32 = arith.constant 0 : i32
    %c0_i32_0 = arith.constant 0 : i32
    %c0_i32_1 = arith.constant 0 : i32
    return %c0_i32, %c0_i32_0 : i32, i32
  }
  func.func @transform_9(%arg0: i32, %arg1: i32) -> (i32, i32) {
    %c0_i32 = arith.constant 0 : i32
    %c0_i32_0 = arith.constant 0 : i32
    %c0_i32_1 = arith.constant 0 : i32
    return %c0_i32, %c0_i32_0 : i32, i32
  }
  func.func @transform_10(%arg0: i32, %arg1: i32) -> (i32, i32, i32) {
    %c0_i32 = arith.constant 0 : i32
    %c0_i32_0 = arith.constant 0 : i32
    return %arg0, %arg1, %c0_i32 : i32, i32, i32
  }
}

</mosaic_0001>

<bundles_post_ra>
// kernel: tpu_custom_call.1
= control target key start
LH: loop header
LB: loop body
LE: loop exit
PB: predicated region body
PF: predicated region fallthrough
CT: control target
= control target key end

     0   :  { %s4614_s0 = inlined_call_operand.hbm [shape: bf16[2,16,32], index: 0, kind: input, shape index: {}]   ;;  %s4615_s1 = inlined_call_operand.hbm [shape: bf16[2,16,32], index: 1, kind: input, shape index: {}]   ;;  %s4616_s2 = inlined_call_operand.hbm [shape: bf16[32,32], index: 2, kind: input, shape index: {}]   ;;  %s4617_s3 = inlined_call_operand.vmem [shape: f32[1,32], index: 3, kind: input, shape index: {}]   ;;  %s4618_s4 = inlined_call_operand.hbm [shape: bf16[32,32], index: 4, kind: input, shape index: {}]   ;;  %s4619_s5 = inlined_call_operand.vmem [shape: f32[1,32], index: 5, kind: input, shape index: {}]   ;;  %s4620_s6 = inlined_call_operand.hbm [shape: bf16[32,32], index: 6, kind: input, shape index: {}]   ;;  %s4621_s7 = inlined_call_operand.vmem [shape: f32[1,32], index: 7, kind: input, shape index: {}]   ;;  %s4622_s8 = inlined_call_operand.hbm [shape: bf16[32,32], index: 8, kind: input, shape index: {}]   ;;  %s4623_s9 = inlined_call_operand.vmem [shape: f32[1,32], index: 9, kind: input, shape index: {}]   ;;  %s4624_s10 = inlined_call_operand.hbm [shape: bf16[2,16,32], index: 10, kind: output, shape index: {}]  }
   0x1   :  { %4638 = sst [smem:[#allocation35_spill]] %s4614_s0 }
   0x2   :  { %4639 = sst [smem:[#allocation36_spill]] %s4616_s2 }
   0x3   :  { %4640 = sst [smem:[#allocation37_spill]] %s4617_s3 }
   0x4   :  { %4641 = sst [smem:[#allocation38_spill]] %s4618_s4 }
   0x5   :  { %4642 = sst [smem:[#allocation39_spill]] %s4620_s6 }
   0x6   :  { %4643 = sst [smem:[#allocation40_spill]] %s4622_s8 }
   0x7   :  { %4644 = sst [smem:[#allocation41_spill]] %s4623_s9 }
   0x8   :  { %4645 = sst [smem:[#allocation42_spill]] %s4624_s10 }
   0x9   :  { %15 = vsyncpa [#allocation8], 0 }
   0xa   :  { %17 = vsyncpa [#allocation8 + $0x1], 0 }
   0xb   :  { %18 = vsyncpa [#allocation11], 0 }
   0xc   :  { %20 = vsyncpa [#allocation11 + $0x1], 0 }
   0xd   :  { %21 = vsyncpa [#allocation14], 0 }
   0xe   :  { %22 = vsyncpa [#allocation17], 0 }
   0xf   :  { %23 = vsyncpa [#allocation9], 0 }
  0x10   :  { %25 = vsyncpa [#allocation9 + $0x1], 0  ;;  %s3810_s13 = smov 0   ;;  %s3812_s14 = smov 0  }
  0x11   :  { %s3814_s15 = smov 0   ;;  %s3816_s16 = smov 0  }
  0x12   :  { %s3818_s17 = smov 0   ;;  %s3820_s18 = smov 0  }
  0x13   :  { %s3822_s19 = smov 0   ;;  %s3824_s20 = smov 0  }
  0x14   :  { %s3826_s21 = smov 0   ;;  %s3828_s22 = smov 0  }
  0x15   :  { %s3830_s23 = smov 0  }
  0x16 LB: > { %4646 = sst [smem:[#allocation25_spill]] %s3692_s15  ;;  %s3866_s24 = sadd.s32 4294967295, %s3724_s23   ;;  %s3724_s23 = sphi %s3830_s23, %s31_s23   ;;  %s3720_s22 = sphi %s3828_s22, %s4700_s22   ;;  %s3716_s21 = sphi %s3826_s21, %s4693_s21   ;;  %s3712_s20 = sphi %s3824_s20, %s4699_s20   ;;  %s3708_s19 = sphi %s3822_s19, %s4692_s19   ;;  %s3704_s18 = sphi %s3820_s18, %s4691_s18   ;;  %s3700_s17 = sphi %s3818_s17, %s4698_s17   ;;  %s3696_s16 = sphi %s3816_s16, %s4697_s16   ;;  %s3692_s15 = sphi %s3814_s15, %s4689_s15   ;;  %s3688_s14 = sphi %s3812_s14, %s4696_s14   ;;  %s3684_s13 = sphi %s3810_s13, %s4695_s13  }
  0x17   : > { %4647 = sst [smem:[#allocation26_spill]] %s3696_s16  ;;  %p2951_p0 = scmp.ge.s32.totalorder %s3724_s23, 1 }
  0x18   : > { %4648 = sst [smem:[#allocation27_spill]] %s3704_s18  ;;  %p4633_p1 = scmp.eq.s32.totalorder %s3866_s24, 0 }
  0x19   : > { %4649 = sst [smem:[#allocation28_spill]] %s3712_s20  ;;  %p298_p2 = scmp.lt.s32.totalorder %s3724_s23, 5 }
  0x1a   : > { %4650 = sst [smem:[#allocation29_spill]] %s3716_s21  ;;  %s3726_s26 = smov [#allocation12]  }
  0x1b   : > { %p3871_p3 = pnand %p2951_p0, %p298_p2  ;;  %s310_s27 = sshll.u32 %s3726_s26, 4  ;;  %s311_s27 = int_to_ptr.vmem [resolvable:$true] %s310_s27 }
  0x1c   : > { %s3727_s29 = smov [#allocation13]   ;;  %s3728_s11 = smov [#allocation15]  }
  0x1d   : > { %p3229_p4 = pneg %p3871_p3  ;;  %s326_s30 = sshll.u32 %s3727_s29, 4  ;;  %s327_s30 = int_to_ptr.vmem [resolvable:$true] %s326_s30 }
  0x1e   : > { %s342_s12 = sshll.u32 %s3728_s11, 4  ;;  %s3439_s10 = scalar_lea.vmem %s311_s27, 256  ;;  %s343_s12 = int_to_ptr.vmem [resolvable:$true] %s342_s12 }
  0x1f   : > { %p3879_p5 = pnand %p3229_p4, %p4633_p1  ;;  %p3440_p7 = scmp.ne.s32.totalorder %s311_s27, %s3439_s10 }
  0x20   : > { %p3447_p10 = scmp.lt.s32.totalorder %s311_s27, %s311_s27  ;;  %p3448_p11 = scmp.lt.s32.totalorder %s3439_s10, %s3439_s10 }
  0x21   : > { %p3430_p6 = pneg %p3879_p5 }
  0x22   : > { %p3449_p12 = por %p3448_p11, %p3447_p10 }
  0x23   : > { %p3442_p8 = pnand %p3440_p7, %p3430_p6 }
  0x25   : > { %p3443_p9 = pneg %p3442_p8 }
  0x27   : > { %p3450_p13 = pnand %p3449_p12, %p3443_p9 }
  0x29   : > { %3453 = shalt.err (!%p3450_p13)
}
  0x2a   : > { %s4626_s26 = smov 64   ;;  %s4627_s29 = smov 4  }
  0x2b   : > { %s4653_s2 = sld [smem:[#allocation36_spill]]  ;;  %s3465_s20 = scalar_lea.vmem %s327_s30, 256 }
  0x2c   : > { %p3466_p0 = scmp.ne.s32.totalorder %s327_s30, %s3465_s20  ;;  %p3473_p7 = scmp.lt.s32.totalorder %s327_s30, %s327_s30 }
  0x2d   : > { %p3474_p8 = scmp.lt.s32.totalorder %s3465_s20, %s3465_s20 }
  0x2e   : > { %p3468_p2 = pnand %p3466_p0, %p3430_p6 }
  0x2f   : > { %p3475_p9 = por %p3474_p8, %p3473_p7 }
  0x30   : > { %p3469_p4 = pneg %p3468_p2 }
  0x31   : > { %3232 = dma.hbm_to_vmem [thread:$0]  (!%p3879_p5), %s4653_s2, 256, %s311_s27, [#allocation11], %s4626_s26, %s4626_s26, %s4627_s29  }
  0x32   : > { %p3476_p10 = pnand %p3475_p9, %p3469_p4 }
  0x34   : > { %3479 = shalt.err (!%p3476_p10)
}
  0x35   : > { %s4654_s4 = sld [smem:[#allocation38_spill]]  ;;  %s3491_s9 = scalar_lea.vmem %s343_s12, 256 }
  0x36   : > { %p3492_p11 = scmp.ne.s32.totalorder %s343_s12, %s3491_s9  ;;  %p3499_p0 = scmp.lt.s32.totalorder %s343_s12, %s343_s12 }
  0x37   : > { %p3500_p2 = scmp.lt.s32.totalorder %s3491_s9, %s3491_s9 }
  0x38   : > { %p3494_p12 = pnand %p3492_p11, %p3430_p6 }
  0x39   : > { %p3501_p4 = por %p3500_p2, %p3499_p0 }
  0x3a   : > { %p3495_p13 = pneg %p3494_p12 }
  0x3b   : > { %3235 = dma.hbm_to_vmem [thread:$0]  (!%p3879_p5), %s4654_s4, 256, %s327_s30, [#allocation14], %s4626_s26, %s4626_s26, %s4627_s29  }
  0x3c   : > { %p3502_p7 = pnand %p3501_p4, %p3495_p13 }
  0x3e   : > { %3505 = shalt.err (!%p3502_p7)
}
  0x3f   : > { %s4655_s6 = sld [smem:[#allocation39_spill]]  ;;  %s3731_s27 = smov [#allocation16]  }
  0x40   : > { %s358_s30 = sshll.u32 %s3731_s27, 4  ;;  %s359_s30 = int_to_ptr.vmem [resolvable:$true] %s358_s30 }
  0x41   : > { %s3517_s11 = scalar_lea.vmem %s359_s30, 256  ;;  %p3525_p11 = scmp.lt.s32.totalorder %s359_s30, %s359_s30 }
  0x42   : > { %p3518_p8 = scmp.ne.s32.totalorder %s359_s30, %s3517_s11  ;;  %p3526_p12 = scmp.lt.s32.totalorder %s3517_s11, %s3517_s11 }
  0x44   : > { %p3520_p9 = pnand %p3518_p8, %p3430_p6  ;;  %p3527_p13 = por %p3526_p12, %p3525_p11 }
  0x45   : > { %3238 = dma.hbm_to_vmem [thread:$0]  (!%p3879_p5), %s4655_s6, 256, %s343_s12, [#allocation14], %s4626_s26, %s4626_s26, %s4627_s29  }
  0x46   : > { %p3521_p10 = pneg %p3520_p9 }
  0x48   : > { %p3528_p0 = pnand %p3527_p13, %p3521_p10 }
  0x4a   : > { %3531 = shalt.err (!%p3528_p0)
}
  0x4b   : > { %s4656_s8 = sld [smem:[#allocation40_spill]]  ;;  %s2950_s28 = sadd.s32 4294967294, %s3724_s23  }
  0x4c   : > { %s40_s9 = sadd.s32 1, %s3716_s21  ;;  %s43_s3 = sadd.s32 1, %s3720_s22 }
  0x4d   : > { %p41_p6 = scmp.ge.s32.totalorder %s40_s9, 2  ;;  %s52_s20 = sadd.s32 1, %s3704_s18 }
  0x4e   : > { %p59_p2 = scmp.ne.s32.totalorder %s3704_s18, %s3700_s17  ;;  %p4628_p7 = scmp.ne.s32.totalorder %s3700_s17, %s3696_s16 }
  0x4f   : > { %s4702_s9 = smov (%p41_p6, %s40_s9), 0  ;;  %s4704_s3 = smov (!%p41_p6, %s43_s3), %s3720_s22 }
  0x50   : > { %4657 = sst [smem:[#allocation30_spill]] %s4702_s9  ;;  %s48_s27 = ssub.s32 %s3716_s21, %s4702_s9 }
  0x51   : > { %3241 = dma.hbm_to_vmem [thread:$0]  (!%p3879_p5), %s4656_s8, 256, %s359_s30, [#allocation17], %s4626_s26, %s4626_s26, %s4627_s29  }
  0x52   : > { %p60_p5 = scmp.eq.s32.totalorder %s3724_s23, 0  ;;  %p45_p4 = scmp.ge.s32.totalorder %s4704_s3, 2 }
  0x53   : > { %s78_s11 = sadd.s32 1, %s3692_s15  ;;  %p3960_p9 = por %p4633_p1, %p4628_p7 }
  0x54   : > { %p3948_p8 = por %p60_p5, %p59_p2  ;;  %s4706_s3 = smov (%p45_p4, %s4704_s3), 0 }
  0x55   : > { %4659 = sst [smem:[#allocation31_spill]] %s4706_s3  ;;  %p85_p10 = scmp.ne.s32.totalorder %s3692_s15, %s3688_s14 }
  0x56   : > { %s47_s10 = ssub.s32 %s3720_s22, %s4706_s3  ;;  %p91_p11 = scmp.ne.s32.totalorder %s3688_s14, %s3684_s13 }
  0x57   : > { %s49_s26 = sor.u32 %s48_s27, %s47_s10  ;;  %p76_p12 = scmp.eq.s32.totalorder %s47_s10, 0 }
  0x58   : > { %p50_p13 = scmp.eq.s32.totalorder %s49_s26, 0  ;;  %p3972_p0 = por %p85_p10, %p60_p5 }
  0x59   : > { %s3977_s2 = scalar_select %p76_p12, %s3692_s15, %s78_s11  }
  0x5a   : > { %s3980_s4 = scalar_select %p50_p13, %s3704_s18, %s52_s20  }
  0x5b   : > { %4662 = sst [smem:[#allocation32_spill]] %s3977_s2  ;;  %p3984_p6 = por %p91_p11, %p4633_p1 }
  0x5c   : > { %4663 = sst [smem:[#allocation33_spill]] %s3980_s4  ;;  %p285_p4 = scmp.eq.s32.totalorder %s3866_s24, 3 }
  0x5d   : > { %p291_p7 = scmp.eq.s32.totalorder %s2950_s28, 3  ;;  %p3257_p5 = scmp.lt.s32.totalorder %s3724_s23, 4 }
  0x5e   : > { %p3993_p10 = por %p285_p4, %p59_p2  ;;  %s375_s26 = sand.u32 1, %s3704_s18  }
  0x5f   : > { %p4666_p12 = scmp.ne.s32.totalorder %s3700_s17, %s3696_s16  ;;  %s2957_s27 = sshll.u32 %s375_s26, 2 }
  0x60   : > { %s4665_s13 = scalar_select %p3993_p10, 1, 0 }
  0x61   : > { %p4001_p13 = por %p291_p7, %p4666_p12  ;;  %s2958_s11 = sshll.u32 %s3720_s22, 1 }
  0x62   : > { %s384_s10 = sadd.s32 %s3716_s21, %s2958_s11  ;;  %s379_s3 = scalar_lea.vmem [#allocation7], %s2957_s27 }
  0x63   : > { %s4667_s20 = scalar_select %p4001_p13, 1, 0 }
  0x64   : > { %s2959_s8 = sshll.u32 %s384_s10, 6  ;;  %s388_s9 = sshll.u32 %s379_s3, 4  ;;  %s389_s9 = int_to_ptr.vmem [resolvable:$true] %s388_s9 }
  0x65   : > { %4668 = sst [smem:[#allocation34_spill]] %s4667_s20  ;;  %p4014_p2 = pnand %p3257_p5, %p3948_p8 }
  0x66   : > { %s4669_s0 = sld [smem:[#allocation35_spill]]  ;;  %p4022_p7 = pnand %p3257_p5, %p3972_p0 }
  0x67   : > { %s395_s27 = sand.u32 1, %s3724_s23   ;;  %s397_s3 = sand.u32 1, %s3692_s15  }
  0x68   : > { %s376_s11 = scalar_lea.sflag [#allocation8], %s375_s26  ;;  %p3534_p11 = pneg %p4014_p2 }
  0x69   : > { %s3545_s4 = scalar_lea.vmem %s389_s9, 64 }
  0x6a   : > { %p3546_p4 = scmp.ne.s32.totalorder %s389_s9, %s3545_s4 }
  0x6c   : > { %s386_s2 = scalar_lea.hbm %s4669_s0, %s2959_s8  ;;  %p3548_p12 = pnand %p3546_p4, %p3534_p11 }
  0x6d   : > { %s3732_s8 = smov [#allocation7]  }
  0x6e   : > { %p3549_p1 = pneg %p3548_p12  ;;  %s3550_s30 = sshll.u32 %s3732_s8, 4  ;;  %s3551_s30 = int_to_ptr.vmem [resolvable:$false] %s3550_s30 }
  0x6f   : > { %s3552_s10 = scalar_lea.vmem %s3551_s30, 128  ;;  %p3553_p8 = scmp.lt.s32.totalorder %s389_s9, %s3551_s30 }
  0x70   : > { %p3554_p13 = scmp.lt.s32.totalorder %s3552_s10, %s3545_s4 }
  0x72   : > { %p3555_p10 = por %p3554_p13, %p3553_p8 }
  0x74   : > { %p3556_p0 = pnand %p3555_p10, %p3549_p1 }
  0x76   : > { %3559 = shalt.err (!%p3556_p0)
}
  0x77   : > { %3245 = dma.hbm_to_vmem [thread:$0]  (!%p4014_p2), %s386_s2, 64, %s389_s9, %s376_s11  }
  0x78   : > { %s2960_s29 = sshll.u32 %s397_s3, 3  ;;  %s3034_s26 = sshll.u32 %s3720_s22, 7 }
  0x79   : > { %s405_s21 = scalar_lea.hbm %s4615_s1, %s3034_s26  ;;  %s399_s15 = scalar_lea.vmem [#allocation10], %s2960_s29 }
  0x7a   : > { %s406_s8 = sshll.u32 %s399_s15, 4  ;;  %s396_s16 = scalar_lea.sflag [#allocation11], %s395_s27  ;;  %s407_s8 = int_to_ptr.vmem [resolvable:$true] %s406_s8 }
  0x7b   : > { %p3562_p5 = pneg %p4022_p7  ;;  %s3573_s4 = scalar_lea.vmem %s407_s8, 128 }
  0x7c   : > { %p3574_p1 = scmp.ne.s32.totalorder %s407_s8, %s3573_s4  ;;  %s3733_s18 = smov [#allocation10]  }
  0x7d   : > { %s3578_s30 = sshll.u32 %s3733_s18, 4  ;;  %s3579_s30 = int_to_ptr.vmem [resolvable:$false] %s3578_s30 }
  0x7e   : > { %p3576_p10 = pnand %p3574_p1, %p3562_p5  ;;  %s3580_s2 = scalar_lea.vmem %s3579_s30, 256 }
  0x7f   : > { %p3581_p2 = scmp.lt.s32.totalorder %s407_s8, %s3579_s30  ;;  %p3582_p11 = scmp.lt.s32.totalorder %s3580_s2, %s3573_s4 }
  0x80   : > { %p3577_p13 = pneg %p3576_p10 }
  0x81   : > { %p3583_p4 = por %p3582_p11, %p3581_p2 }
  0x83   : > { %p3584_p12 = pnand %p3583_p4, %p3577_p13 }
  0x85   : > { %3587 = shalt.err (!%p3584_p12)
}
  0x86   : > { %s4672_s0 = smov 4   ;;  %s4673_s15 = smov 64  }
  0x87   : > { %3248 = dma.hbm_to_vmem [thread:$0]  (!%p4022_p7), %s405_s21, 128, %s407_s8, %s396_s16, %s4673_s15, %s4673_s15, %s4672_s0  }
  0x88   : > { %418 = sbr.rel (%p3871_p3) target bundleno = 2518 (0x9d6), region = 60  ;;  %s4046_s9 = sand.u32 (!%p3871_p3), 1, %s3700_s17  }
  0x89   : > { %s2964_s27 = sshll.u32 (!%p3871_p3), %s4046_s9, 2  ;;  %s421_s3 = scalar_lea.sflag (!%p3871_p3), [#allocation8], %s4046_s9 }
  0x8a   : > { %s4050_s11 = scalar_lea.vmem (!%p3871_p3), [#allocation7], %s2964_s27 }
  0x8d   : > { %3659 = dma.done.wait (%p3960_p9), %s421_s3, 64  }
  0x8e   : > { %3661 = vsyncadd (%p3960_p9), %s421_s3, 4294967232  ;;  %s429_s16 = sand.u32 1, %s3866_s24   ;;  %s431_s21 = sand.u32 1, %s3688_s14  }
  0x8f   : > { %s2965_s25 = sshll.u32 %s431_s21, 3  ;;  %s430_s20 = scalar_lea.sflag [#allocation11], %s429_s16 }
  0x90   : > { %s433_s10 = scalar_lea.vmem [#allocation10], %s2965_s25 }
  0x91   : > { %3663 = dma.done.wait (%p3984_p6), %s430_s20, 128  }
  0x92   : > { %3665 = vsyncadd (%p3984_p6), %s430_s20, 4294967168  ;;  %p4674_p3 = scmp.eq.s32.totalorder %s3866_s24, 0 }
  0x94   : > { %3667 = dma.done.wait (%p4674_p3), [#allocation11], 256   ;;  %p4675_p7 = pmov %p4674_p3 }
  0x95   : > { %p4676_p9 = pmov %p4674_p3 }
  0x96   : > { %3669 = vsyncadd (%p4675_p7), [#allocation11], 4294967040 }
  0x97   : > { %3671 = dma.done.wait (%p4676_p9), [#allocation14], 512   ;;  %p4677_p8 = pmov %p4674_p3 }
  0x98   : > { %p4678_p0 = pmov %p4674_p3 }
  0x99   : > { %3673 = vsyncadd (%p4677_p8), [#allocation14], 4294966784 }
  0x9a   : > { %3675 = dma.done.wait (%p4678_p0), [#allocation17], 256   ;;  %p4679_p5 = pmov %p4678_p0 }
  0x9b   : > { %s4074_s6 = scalar_lea.vmem [#allocation18], %s2964_s27  ;;  %p2971_p6 = scmp.ne.s32.totalorder %s3708_s19, 0 }
  0x9c   : > { %3677 = vsyncadd (%p4679_p5), [#allocation17], 4294967040  ;;  %s3736_s28 = smov (!%p2971_p6), 104   ;;  %s3737_s8 = smov (!%p2971_p6), 120  }
  0x9d   : > { %495 = sbr.rel (%p2971_p6) target bundleno = 541 (0x21d), region = 88  ;;  %s3738_s4 = smov (!%p2971_p6), 112  }
  0xa2   : > { %v3377_v0 = vld [vmem:[#allocation13 + $0x8] sm:$0xff]   ;;  %v3734_v1 = vmov 0.0   ;;  %v3378_v2 = vld [vmem:[#allocation15 + $0x8] sm:$0xff]   ;;  %v3379_v3 = vld [vmem:[#allocation13] sm:$0xff]   ;;  %vm3735_vm0 = vmmov 0   ;;  %vm526_vm1 = vcmask 261120   ;;  %v669_v24 = vlaneseq }
  0xa3   : > { %3079 = vmatprep.subr.bf16.mxu0 %v3734_v1  ;;  %3087 = vmatprep.subr.bf16.mxu1 %v3734_v1  ;;  %v3380_v4 = vld [vmem:[#allocation15] sm:$0xff]   ;;  %v3381_v5 = vld [vmem:[%s433_s10] sm:$0xff]   ;;  %v2972_v8 = vld [vmem:[%s4619_s5] ss:$0 sm:$0xff]  ;;  %v3739_v22 = vmov 1983009808  }
  0xa4   : > { %3080 = vmatpush3.bf16.msra.mxu0 %v3377_v0  ;;  %3083 = vmatprep.mubr.msk.bf16.mxu0 %vm3735_vm0, %v3734_v1  ;;  %v2977_v11 = vld [vmem:[%s4621_s7] ss:$0 sm:$0xff]  ;;  %v667_v23 = vunpack.c.l.s4 %v3739_v22  ;;  %v3740_v25 = vmov 1934713408   ;;  %v670_v28 = vshrl.u32 %v669_v24, 7  ;;  %v3741_v29 = vmov 0  }
  0xa5   : > { %3088 = vmatpush3.bf16.msra.mxu1 %v3378_v2  ;;  %3081 = vmatprep.subr.bf16.mxu0 %v3734_v1  ;;  %v698_v26 = vunpack.c.l.s4 %v3740_v25  ;;  %v4083_v30 = vpack.i.b16 %v3741_v29, %v3741_v29  ;;  %vm933_vm2 = vcmask 60416  }
  0xa6   : > { %3089 = vmatprep.subr.bf16.mxu1 %v3734_v1  ;;  %3091 = vmatprep.mubr.msk.bf16.mxu1 %vm3735_vm0, %v3734_v1  ;;  %v668_v27 = vunpack.c.0.s8 %v667_v23 }
  0xa7   : > { %v699_v33 = vunpack.c.0.s8 %v698_v26 }
  0xa8   : > { %3082 = vmatpush3.bf16.msra.mxu0 %v3379_v3  ;;  %v4085_v34 = vsub.s32 %v668_v27, %v670_v28 }
  0xa9   : > { %3090 = vmatpush3.bf16.msra.mxu1 %v3380_v4  ;;  %v4088_v42 = vsub.s32 %v699_v33, %v670_v28 }
  0xab   : > { %3084 = vmatmul.mubr.msk.bf16.vlgmr.msra.gmra.mxu0 %vm526_vm1, %v3381_v5 }
  0xac   : > { %3092 = vmatmul.mubr.msk.bf16.vlgmr.msra.gmra.mxu1 %vm526_vm1, %v3381_v5 }
 0x16b   : > { %v564_v6 = vpop.f32.mrf.mxu0 }
 0x16c   : > { %v628_v7 = vpop.f32.mrf.mxu1  ;;  %v565_v13 = vadd.f32 %v2972_v8, %v564_v6 }
 0x16d   : > { %v3085_v9 = vpop.f32.mrf.mxu0  ;;  %v629_v17 = vadd.f32 %v2977_v11, %v628_v7 }
 0x16e   : > { %v3093_v10 = vpop.f32.mrf.mxu1 }
 0x16f   : > { %v567_v12 = vpop.f32.mrf.mxu0 }
 0x170   : > { %v568_v14 = vadd.f32 %v2972_v8, %v567_v12  ;;  %v631_v15 = vpop.f32.mrf.mxu1 }
 0x171   : > { %v3086_v16 = vpop.f32.mrf.mxu0  ;;  %v632_v19 = vadd.f32 %v2977_v11, %v631_v15 }
 0x172   : > { %v635_v18 = vpack.c.bf16 %v568_v14, %v565_v13  ;;  %v3094_v20 = vpop.f32.mrf.mxu1 }
 0x173   : > { %v942_v21 = vpack.c.bf16 %v632_v19, %v629_v17 }
 0x174   : > { %641 = vrot.lane.b32.xlu1 %v635_v18, %s3736_s28  ;;  %637 = vrot.lane.b32.xlu0 %v635_v18, %s3737_s8  ;;  %v647_v36 = vshrl.u32 %v635_v18, 16 }
 0x175   : > { %v954_v40 = vshrl.u32 %v942_v21, 16 }
 0x178   : > { %944 = vrot.lane.b32.xlu1 %v942_v21, %s3737_s8  ;;  %639 = vrot.lane.b32.xlu0 %v635_v18, %s3738_s4 }
 0x17c   : > { %948 = vrot.lane.b32.xlu1 %v942_v21, %s3736_s28  ;;  %946 = vrot.lane.b32.xlu0 %v942_v21, %s3738_s4 }
 0x1e6   : > { %v642_v31 = vpop.permute.xlu1 %641  ;;  %v638_v32 = vpop.permute.xlu0 %637 }
 0x1e7   : > { %v645_v35 = vpack.i.b16 %v638_v32, %v635_v18  ;;  %v648_v37 = vshrl.u32 %v638_v32, 16  ;;  %v656_v44 = vshrl.u32 %v642_v31, 16 }
 0x1e9   : > { %v649_v38 = vpack.i.b16 %v648_v37, %v647_v36  ;;  %v665_v39 = vcombine.high %v645_v35, %v4083_v30  ;;  %v672_v45 = vrot.slane %v645_v35, %v4085_v34 }
 0x1ea   : > { %v945_v41 = vpop.permute.xlu1 %944  ;;  %v640_v43 = vpop.permute.xlu0 %639 }
 0x1eb   : > { %v731_v46 = vcombine.high %v649_v38, %v4083_v30  ;;  %v952_v47 = vpack.i.b16 %v945_v41, %v942_v21  ;;  %v679_v48 = vrot.slane %v665_v39, %v4085_v34  ;;  %v955_v49 = vshrl.u32 %v945_v41, 16 }
 0x1ec   : > { %v653_v50 = vpack.i.b16 %v642_v31, %v640_v43  ;;  %v655_v51 = vshrl.u32 %v640_v43, 16  ;;  %v738_v52 = vrot.slane %v649_v38, %v4085_v34 }
 0x1ed   : > { %v745_v53 = vrot.slane %v731_v46, %v4085_v34  ;;  %v966_v54 = vcombine.high %v952_v47, %v4083_v30  ;;  %v4097_v55 = vrot.slane %v952_v47, %v4085_v34  ;;  %v956_v56 = vpack.i.b16 %v955_v49, %v954_v40 }
 0x1ee   : > { %v657_v57 = vpack.i.b16 %v656_v44, %v655_v51  ;;  %v680_v58 = vcombine.high %v653_v50, %v4083_v30  ;;  %v687_v59 = vrot.slane %v653_v50, %v4085_v34  ;;  %v949_v60 = vpop.permute.xlu1 %948  ;;  %v947_v61 = vpop.permute.xlu0 %946 }
 0x1ef   : > { %v4102_v62 = vrot.slane %v966_v54, %v4085_v34  ;;  %v963_v63 = vshrl.u32 %v949_v60, 16  ;;  %v960_v0 = vpack.i.b16 %v949_v60, %v947_v61  ;;  %v962_v1 = vshrl.u32 %v947_v61, 16 }
 0x1f0   : > { %v1032_v2 = vcombine.high %v956_v56, %v4083_v30  ;;  %v4106_v3 = vrot.slane %v956_v56, %v4085_v34  ;;  %v694_v4 = vrot.slane %v680_v58, %v4085_v34  ;;  %v695_v5 = vcombine.low %v672_v45, %v687_v59 }
 0x1f1   : > { %v696_v6 = vcombine.high %v672_v45, %v687_v59  ;;  %v746_v7 = vcombine.high %v657_v57, %v4083_v30  ;;  %v753_v8 = vrot.slane %v657_v57, %v4085_v34  ;;  %v964_v9 = vpack.i.b16 %v963_v63, %v962_v1 }
 0x1f2   : > { %v4112_v10 = vrot.slane %v1032_v2, %v4085_v34  ;;  %v703_v11 = vrot.slane %v695_v5, %v4088_v42  ;;  %v711_v12 = vcombine.low %v679_v48, %v694_v4  ;;  %v712_v13 = vcombine.high %v679_v48, %v694_v4 }
 0x1f3   : > { %v710_v14 = vrot.slane %v696_v6, %v4088_v42  ;;  %v760_v15 = vrot.slane %v746_v7, %v4085_v34  ;;  %v761_v16 = vcombine.low %v738_v52, %v753_v8  ;;  %v762_v17 = vcombine.high %v738_v52, %v753_v8 }
 0x1f4   : > { %v719_v18 = vrot.slane %v711_v12, %v4088_v42  ;;  %v726_v19 = vrot.slane %v712_v13, %v4088_v42  ;;  %v981_v20 = vcombine.high %v960_v0, %v4083_v30  ;;  %v988_v21 = vrot.slane %v960_v0, %v4085_v34 }
 0x1f5   : > { %v769_v22 = vrot.slane %v761_v16, %v4088_v42  ;;  %v776_v23 = vrot.slane %v762_v17, %v4088_v42  ;;  %v777_v24 = vcombine.low %v745_v53, %v760_v15  ;;  %v778_v25 = vcombine.high %v745_v53, %v760_v15 }
 0x1f6   : > { %v797_v26 = vcombine.low %v703_v11, %v710_v14  ;;  %v2981_v27 = vcombine.high %v703_v11, %v710_v14  ;;  %v813_v28 = vcombine.low %v719_v18, %v726_v19  ;;  %v2982_v29 = vcombine.high %v719_v18, %v726_v19 }
 0x1f7   : > { %v785_v31 = vrot.slane %v777_v24, %v4088_v42  ;;  %v792_v32 = vrot.slane %v778_v25, %v4088_v42  ;;  %v847_v33 = vcombine.low %v769_v22, %v776_v23  ;;  %v2983_v35 = vcombine.high %v769_v22, %v776_v23 }
 0x1f8   : > { %v804_v36 = vrot.slane %v797_v26, %v4085_v34  ;;  %v812_v37 = vrot.slane %v2981_v27, %v4085_v34  ;;  %v820_v38 = vrot.slane %v813_v28, %v4085_v34  ;;  %v828_v39 = vrot.slane %v2982_v29, %v4085_v34 }
 0x1f9   : > { %v854_v40 = vrot.slane %v847_v33, %v4085_v34  ;;  %v862_v41 = vrot.slane %v2983_v35, %v4085_v34  ;;  %v863_v43 = vcombine.low %v785_v31, %v792_v32  ;;  %v2984_v44 = vcombine.high %v785_v31, %v792_v32 }
 0x1fa   : > { %v829_v45 = vcombine.low %v804_v36, %v812_v37  ;;  %v837_v46 = vcombine.low %v820_v38, %v828_v39  ;;  %v995_v47 = vrot.slane %v981_v20, %v4085_v34  ;;  %v996_v48 = vcombine.low %v4097_v55, %v988_v21 }
 0x1fb   : > { %v870_v49 = vrot.slane %v863_v43, %v4085_v34  ;;  %v878_v50 = vrot.slane %v2984_v44, %v4085_v34  ;;  %v879_v51 = vcombine.low %v854_v40, %v862_v41  ;;  %v997_v52 = vcombine.high %v4097_v55, %v988_v21 }
 0x1fc   : > { %v836_v53 = vrot.slane %v829_v45, %v4088_v42  ;;  %v844_v54 = vrot.slane %v837_v46, %v4088_v42  ;;  %v1004_v56 = vrot.slane %v996_v48, %v4088_v42  ;;  %v1012_v57 = vcombine.low %v4102_v62, %v995_v47 }
 0x1fd   : > { %v886_v58 = vrot.slane %v879_v51, %v4088_v42  ;;  %v887_v59 = vcombine.low %v870_v49, %v878_v50  ;;  %v1011_v60 = vrot.slane %v997_v52, %v4088_v42  ;;  %v1013_v61 = vcombine.high %v4102_v62, %v995_v47 }
 0x1fe   : > { %v845_v63 = vcombine.low %v836_v53, %v844_v54  ;;  %v846_v0 = vcombine.high %v836_v53, %v844_v54  ;;  %v1020_v55 = vrot.slane %v1012_v57, %v4088_v42  ;;  %v1047_v1 = vcombine.high %v964_v9, %v4083_v30 }
 0x1ff   : > { %v894_v2 = vrot.slane %v887_v59, %v4088_v42  ;;  %v1027_v4 = vrot.slane %v1013_v61, %v4088_v42  ;;  %v1054_v5 = vrot.slane %v964_v9, %v4085_v34  ;;  %v1098_v6 = vcombine.low %v1004_v56, %v1011_v60 }
 0x200   : > { %v900_v7 = vshrl.u32 %v845_v63, 16  ;;  %v906_v8 = vshrl.u32 %v846_v0, 16  ;;  %v1061_v11 = vrot.slane %v1047_v1, %v4085_v34  ;;  %v2993_v12 = vcombine.high %v1004_v56, %v1011_v60 }
 0x201   : > { %v895_v13 = vcombine.low %v886_v58, %v894_v2  ;;  %v896_v62 = vcombine.high %v886_v58, %v894_v2  ;;  %v1062_v14 = vcombine.low %v4106_v3, %v1054_v5  ;;  %v1063_v15 = vcombine.high %v4106_v3, %v1054_v5 }
 0x202   : > { %v1078_v30 = vcombine.low %v4112_v10, %v1061_v11  ;;  %v1079_v16 = vcombine.high %v4112_v10, %v1061_v11  ;;  %v1105_v17 = vrot.slane %v1098_v6, %v4085_v34  ;;  %v1113_v9 = vrot.slane %v2993_v12, %v4085_v34 }
 0x203   : > { %v899_v18 = vpack.i.b16 %v895_v13, %v845_v63  ;;  %v901_v19 = vshrl.u32 %v895_v13, 16  ;;  %v905_v20 = vpack.i.b16 %v896_v62, %v846_v0  ;;  %v907_v21 = vshrl.u32 %v896_v62, 16 }
 0x204   : > { %v1070_v22 = vrot.slane %v1062_v14, %v4088_v42  ;;  %v1077_v23 = vrot.slane %v1063_v15, %v4088_v42  ;;  %v1086_v24 = vrot.slane %v1078_v30, %v4088_v42  ;;  %v1093_v3 = vrot.slane %v1079_v16, %v4088_v42 }
 0x205   : > { %v902_v25 = vpack.i.b16 %v901_v19, %v900_v7  ;;  %v908_v26 = vpack.i.b16 %v907_v21, %v906_v8  ;;  %v2985_v27 = vcombine.low %v899_v18, %v899_v18  ;;  %v2986_v10 = vcombine.high %v899_v18, %v899_v18 }
 0x206   : > { %v2989_v28 = vcombine.low %v905_v20, %v905_v20  ;;  %v2990_v29 = vcombine.high %v905_v20, %v905_v20  ;;  %v1114_v31 = vcombine.low %v1020_v55, %v1027_v4  ;;  %v2994_v32 = vcombine.high %v1020_v55, %v1027_v4 }
 0x207   : > { %v2987_v33 = vcombine.low %v902_v25, %v902_v25  ;;  %v2988_v35 = vcombine.high %v902_v25, %v902_v25  ;;  %v2991_v36 = vcombine.low %v908_v26, %v908_v26  ;;  %v2992_v37 = vcombine.high %v908_v26, %v908_v26  ;;  %934 = vst.msk [vmem:[#allocation2] sm:$0xf] %vm933_vm2, %v2985_v27 }
 0x208   : > { %935 = vst.msk [vmem:[#allocation2 + $0x4] sm:$0xf] %vm933_vm2, %v2986_v10  ;;  %938 = vst.msk [vmem:[#allocation2 + $0x10] sm:$0xf] %vm933_vm2, %v2989_v28  ;;  %v1121_v38 = vrot.slane %v1114_v31, %v4085_v34  ;;  %v1129_v39 = vrot.slane %v2994_v32, %v4085_v34  ;;  %v1130_v40 = vcombine.low %v1105_v17, %v1113_v9 }
 0x209   : > { %939 = vst.msk [vmem:[#allocation2 + $0x14] sm:$0xf] %vm933_vm2, %v2990_v29  ;;  %v1148_v41 = vcombine.low %v1070_v22, %v1077_v23  ;;  %936 = vst.msk [vmem:[#allocation2 + $0x8] sm:$0xf] %vm933_vm2, %v2987_v33  ;;  %v2995_v43 = vcombine.high %v1070_v22, %v1077_v23  ;;  %v1164_v44 = vcombine.low %v1086_v24, %v1093_v3 }
 0x20a   : > { %937 = vst.msk [vmem:[#allocation2 + $0xc] sm:$0xf] %vm933_vm2, %v2988_v35  ;;  %940 = vst.msk [vmem:[#allocation2 + $0x18] sm:$0xf] %vm933_vm2, %v2991_v36  ;;  %v2996_v45 = vcombine.high %v1086_v24, %v1093_v3  ;;  %v1138_v46 = vcombine.low %v1121_v38, %v1129_v39  ;;  %v1137_v51 = vrot.slane %v1130_v40, %v4088_v42 }
 0x20b   : > { %941 = vst.msk [vmem:[#allocation2 + $0x1c] sm:$0xf] %vm933_vm2, %v2992_v37  ;;  %v1155_v47 = vrot.slane %v1148_v41, %v4085_v34  ;;  %v1163_v48 = vrot.slane %v2995_v43, %v4085_v34  ;;  %v1171_v49 = vrot.slane %v1164_v44, %v4085_v34 }
 0x20c   : > { %v1179_v50 = vrot.slane %v2996_v45, %v4085_v34  ;;  %v1145_v52 = vrot.slane %v1138_v46, %v4088_v42 }
 0x20d   : > { %v1180_v53 = vcombine.low %v1155_v47, %v1163_v48 }
 0x20e   : > { %v1188_v54 = vcombine.low %v1171_v49, %v1179_v50  ;;  %v1146_v56 = vcombine.low %v1137_v51, %v1145_v52  ;;  %v1147_v57 = vcombine.high %v1137_v51, %v1145_v52 }
 0x20f   : > { %v1187_v58 = vrot.slane %v1180_v53, %v4088_v42 }
 0x210   : > { %v1195_v59 = vrot.slane %v1188_v54, %v4088_v42  ;;  %v1201_v63 = vshrl.u32 %v1146_v56, 16  ;;  %v1207_v0 = vshrl.u32 %v1147_v57, 16 }
 0x212   : > { %v1196_v60 = vcombine.low %v1187_v58, %v1195_v59  ;;  %v1197_v61 = vcombine.high %v1187_v58, %v1195_v59 }
 0x214   : > { %v1200_v55 = vpack.i.b16 %v1196_v60, %v1146_v56  ;;  %v1202_v1 = vshrl.u32 %v1196_v60, 16  ;;  %v1206_v2 = vpack.i.b16 %v1197_v61, %v1147_v57  ;;  %v1208_v34 = vshrl.u32 %v1197_v61, 16 }
 0x216   : > { %v1203_v4 = vpack.i.b16 %v1202_v1, %v1201_v63  ;;  %v1209_v5 = vpack.i.b16 %v1208_v34, %v1207_v0  ;;  %v2997_v6 = vcombine.low %v1200_v55, %v1200_v55  ;;  %v2998_v7 = vcombine.high %v1200_v55, %v1200_v55 }
 0x217   : > { %v3001_v8 = vcombine.low %v1206_v2, %v1206_v2  ;;  %v3002_v11 = vcombine.high %v1206_v2, %v1206_v2 }
 0x218   : > { %v2999_v12 = vcombine.low %v1203_v4, %v1203_v4  ;;  %v3000_v13 = vcombine.high %v1203_v4, %v1203_v4  ;;  %v3003_v62 = vcombine.low %v1209_v5, %v1209_v5  ;;  %v3004_v14 = vcombine.high %v1209_v5, %v1209_v5  ;;  %1234 = vst.msk [vmem:[#allocation3] sm:$0xf] %vm933_vm2, %v2997_v6 }
 0x219   : > { %1235 = vst.msk [vmem:[#allocation3 + $0x4] sm:$0xf] %vm933_vm2, %v2998_v7  ;;  %1238 = vst.msk [vmem:[#allocation3 + $0x10] sm:$0xf] %vm933_vm2, %v3001_v8 }
 0x21a   : > { %1239 = vst.msk [vmem:[#allocation3 + $0x14] sm:$0xf] %vm933_vm2, %v3002_v11  ;;  %1236 = vst.msk [vmem:[#allocation3 + $0x8] sm:$0xf] %vm933_vm2, %v2999_v12 }
 0x21b   : > { %1237 = vst.msk [vmem:[#allocation3 + $0xc] sm:$0xf] %vm933_vm2, %v3000_v13  ;;  %1240 = vst.msk [vmem:[#allocation3 + $0x18] sm:$0xf] %vm933_vm2, %v3003_v62 }
 0x21c   : > { %1241 = vst.msk [vmem:[#allocation3 + $0x1c] sm:$0xf] %vm933_vm2, %v3004_v14 }
 0x21d PF: > { %v3384_v42 = vld [vmem:[#allocation12 + $0x8] sm:$0xff]   ;;  %v3742_v15 = vmov 0.0   ;;  %v3385_v30 = vld [vmem:[#allocation12] sm:$0xff]   ;;  %vm3743_vm3 = vmmov 0   ;;  %vm1266_vm4 = vcmask 261120   ;;  %v3744_v17 = vmov 0  }
 0x21e   : > { %3095 = vmatprep.subr.bf16.mxu0 %v3742_v15  ;;  %3103 = vmatprep.subr.bf16.mxu1 %v3742_v15  ;;  %v1242_v16 = vld [vmem:[%s4050_s11] sm:$0xf]  ;;  %s4680_s2 = sld [smem:[#allocation37_spill]]  ;;  %s3745_s0 = smov 104   ;;  %vm1488_vm5 = vcmask 64512   ;;  %v1321_v28 = vlaneseq  ;;  %vm1479_vm6 = vcmask 7168  }
 0x21f   : > { %3096 = vmatpush3.bf16.msra.mxu0 %v3384_v42  ;;  %3099 = vmatprep.mubr.msk.bf16.mxu0 %vm3743_vm3, %v3742_v15  ;;  %s3746_s15 = smov 120   ;;  %s3747_s27 = smov 112   ;;  %v1493_v24 = vld [vmem:[#allocation2] sm:$0xf]  ;;  %v1494_v3 = vld [vmem:[#allocation2 + $0x8] sm:$0xf] }
 0x220   : > { %3097 = vmatprep.subr.bf16.mxu0 %v3742_v15  ;;  %3105 = vmatprep.mubr.msk.bf16.mxu1 %vm3743_vm3, %v3742_v15  ;;  %v1505_v25 = vsel %vm1488_vm5, %v1493_v24, 0  ;;  %1489 = vst.msk [vmem:[#allocation6] sm:$0xff] %vm1488_vm5, %v3742_v15  ;;  %1490 = vst.msk [vmem:[#allocation6 + $0x8] sm:$0xff] %vm1488_vm5, %v3742_v15  ;;  %v1551_v26 = vsel %vm1488_vm5, %v1494_v3, 0  ;;  %v3748_v27 = vmov 1983009808  }
 0x221   : > { %3382 = vset.pattern.permute.xlu0 %v3744_v17  ;;  %3383 = vset.pattern.permute.xlu1 %v3744_v17  ;;  %1491 = vst.msk [vmem:[#allocation6 + $0x10] sm:$0xff] %vm1488_vm5, %v3742_v15  ;;  %1492 = vst.msk [vmem:[#allocation6 + $0x18] sm:$0xff] %vm1488_vm5, %v3742_v15  ;;  %v1319_v10 = vunpack.c.l.s4 %v3748_v27  ;;  %v3749_v29 = vmov 1934713408   ;;  %v1322_v33 = vshrl.u32 %v1321_v28, 7  ;;  %vm1812_vm7 = vcmask 1043456  }
 0x222   : > { %3104 = vmatpush3.bf16.xpose.msra.mxu1 %v1505_v25  ;;  %v1336_v31 = vunpack.c.l.s4 %v3749_v29  ;;  %v1496_v24 = vld [vmem:[#allocation2 + $0x18] sm:$0xf]  ;;  %1484 = vst.msk [vmem:[#allocation5] sm:$0xff] %vm1479_vm6, %v3742_v15  ;;  %1485 = vst.msk [vmem:[#allocation5 + $0x8] sm:$0xff] %vm1479_vm6, %v3742_v15  ;;  %s3751_s3 = smov 8   ;;  %s4681_s11 = sld [smem:[#allocation28_spill]] }
 0x223   : > { %3098 = vmatpush3.bf16.msra.mxu0 %v3385_v30  ;;  %3115 = vmatprep.subr.bf16.mxu1 %v3742_v15  ;;  %v1320_v32 = vunpack.c.0.s8 %v1319_v10  ;;  %v1643_v28 = vsel %vm1488_vm5, %v1496_v24, 0  ;;  %1486 = vst.msk [vmem:[#allocation5 + $0x10] sm:$0xff] %vm1479_vm6, %v3742_v15  ;;  %1487 = vst.msk [vmem:[#allocation5 + $0x18] sm:$0xff] %vm1479_vm6, %v3742_v15  ;;  %s3752_s16 = smov 16   ;;  %s3753_s21 = smov 24   ;;  %vm2713_vm8 = vcmask 130048  }
 0x224   : > { %3109 = vmatprep.subr.bf16.mxu0 %v3742_v15  ;;  %v3005_v9 = vld [vmem:[%s4680_s2] ss:$0 sm:$0xff]  ;;  %v1337_v35 = vunpack.c.0.s8 %v1336_v31  ;;  %vm2716_vm9 = vcmask 195584   ;;  %s4682_s12 = sld [smem:[#allocation41_spill]]  ;;  %s2803_s26 = sshll.u32 %s4074_s6, 4  ;;  %vm2785_vm10 = vcmask 257024   ;;  %s4553_s26 = int_to_ptr.vmem [resolvable:$true] %s2803_s26 }
 0x225   : > { %v4214_v36 = vsub.s32 %v1320_v32, %v1322_v33  ;;  %s4683_s4 = sld [smem:[#allocation42_spill]]  ;;  %s3588_s30 = scalar_lea.vmem %s4553_s26, 64 }
 0x226   : > { %3100 = vmatmul.mubr.msk.bf16.vlgmr.msra.gmra.mxu0 %vm1266_vm4, %v1242_v16  ;;  %v4217_v40 = vsub.s32 %v1337_v35, %v1322_v33  ;;  %p3589_p1 = scmp.ne.s32.totalorder %s4553_s26, %s3588_s30  ;;  %p4684_p10 = scmp.ne.s32.totalorder %s4665_s13, 0 }
 0x227   : > { %3111 = vmatprep.mubr.msk.bf16.mxu0 %vm3743_vm3, %v3742_v15  ;;  %3110 = vmatpush3.bf16.xpose.msra.mxu0 %v1551_v26  ;;  %s3754_s2 = smov [#allocation18]  }
 0x228   : > { %3121 = vmatprep.subr.bf16.mxu0 %v3742_v15  ;;  %s3030_s25 = sshll.u32 %s4681_s11, 1  ;;  %p3590_p13 = pnand %p3589_p1, %p4684_p10 }
 0x229   : > { %s2799_s20 = sadd.s32 %s3708_s19, %s3030_s25  ;;  %s2788_s19 = scalar_lea.sflag [#allocation9], %s4046_s9 }
 0x22a   : > { %s3031_s29 = sshll.u32 %s2799_s20, 6  ;;  %p3591_p2 = pneg %p3590_p13 }
 0x22b   : > { %s4551_s18 = scalar_lea.hbm %s4683_s4, %s3031_s29 }
 0x2e6   : > { %v1304_v18 = vpop.f32.mrf.mxu0 }
 0x2e7   : > { %v1305_v19 = vadd.f32 %v3005_v9, %v1304_v18 }
 0x2e8   : > { %v3101_v20 = vpop.f32.mrf.mxu0 }
 0x2e9   : > { %v1310_v21 = vpack.c.bf16 %v1305_v19, %v1305_v19 }
 0x2ea   : > { %v1307_v22 = vpop.f32.mrf.mxu0 }
 0x2eb   : > { %1316 = vrot.lane.b32.xlu1 %v1310_v21, %s3745_s0  ;;  %1312 = vrot.lane.b32.xlu0 %v1310_v21, %s3746_s15  ;;  %v1324_v48 = vrot.slane %v1310_v21, %v4214_v36  ;;  %v1495_v22 = vld [vmem:[#allocation2 + $0x10] sm:$0xf]  ;;  %s3592_s0 = sshll.u32 %s3754_s2, 4  ;;  %s3593_s0 = int_to_ptr.vmem [resolvable:$false] %s3592_s0 }
 0x2ec   : > { %v3102_v23 = vpop.f32.mrf.mxu0  ;;  %v1597_v25 = vsel %vm1488_vm5, %v1495_v22, 0  ;;  %s3594_s15 = scalar_lea.vmem %s3593_s0, 128  ;;  %p3595_p11 = scmp.lt.s32.totalorder %s4553_s26, %s3593_s0 }
 0x2ed   : > { %p3596_p4 = scmp.lt.s32.totalorder %s3594_s15, %s3588_s30 }
 0x2ef   : > { %1314 = vrot.lane.b32.xlu0 %v1310_v21, %s3747_s27  ;;  %p3597_p12 = por %p3596_p4, %p3595_p11 }
 0x2f1   : > { %p3598_p3 = pnand %p3597_p12, %p3591_p2 }
 0x35d   : > { %v1317_v37 = vpop.permute.xlu1 %1316  ;;  %v1313_v38 = vpop.permute.xlu0 %1312 }
 0x35e   : > { %v1366_v39 = vrot.slane %v1317_v37, %v4214_v36  ;;  %v1358_v41 = vrot.slane %v1313_v38, %v4214_v36  ;;  %v3750_v38 = vmov -inf  }
 0x35f   : > { %1480 = vst.msk [vmem:[#allocation4] sm:$0xff] %vm1479_vm6, %v3750_v38  ;;  %1481 = vst.msk [vmem:[#allocation4 + $0x8] sm:$0xff] %vm1479_vm6, %v3750_v38 }
 0x360   : > { %v1367_v43 = vcombine.low %v1358_v41, %v1366_v39  ;;  %v1368_v44 = vcombine.high %v1358_v41, %v1366_v39  ;;  %1482 = vst.msk [vmem:[#allocation4 + $0x10] sm:$0xff] %vm1479_vm6, %v3750_v38  ;;  %1483 = vst.msk [vmem:[#allocation4 + $0x18] sm:$0xff] %vm1479_vm6, %v3750_v38 }
 0x361   : > { %v1315_v45 = vpop.permute.xlu0 %1314 }
 0x362   : > { %v1375_v46 = vrot.slane %v1367_v43, %v4217_v40  ;;  %v1332_v47 = vrot.slane %v1315_v45, %v4214_v36  ;;  %v1382_v49 = vrot.slane %v1368_v44, %v4217_v40 }
 0x364   : > { %v1333_v50 = vcombine.low %v1324_v48, %v1332_v47  ;;  %v1334_v51 = vcombine.high %v1324_v48, %v1332_v47  ;;  %v1383_v52 = vcombine.high %v1375_v46, %v3744_v17  ;;  %v1384_v56 = vcombine.high %v1382_v49, %v3744_v17 }
 0x365   : > { %v1390_v57 = vshrl.u32 %v1375_v46, 16  ;;  %v1406_v0 = vshrl.u32 %v1382_v49, 16 }
 0x366   : > { %v1341_v53 = vrot.slane %v1333_v50, %v4217_v40  ;;  %v1348_v54 = vrot.slane %v1334_v51, %v4217_v40  ;;  %v1398_v63 = vshrl.u32 %v1383_v52, 16  ;;  %v1414_v6 = vshrl.u32 %v1384_v56, 16 }
 0x368   : > { %v1349_v58 = vcombine.high %v1341_v53, %v3744_v17  ;;  %v1350_v59 = vcombine.high %v1348_v54, %v3744_v17  ;;  %v1387_v60 = vpack.i.b16 %v1375_v46, %v1341_v53  ;;  %v1389_v61 = vshrl.u32 %v1341_v53, 16 }
 0x369   : > { %v1403_v55 = vpack.i.b16 %v1382_v49, %v1348_v54  ;;  %v1405_v1 = vshrl.u32 %v1348_v54, 16 }
 0x36a   : > { %v1391_v2 = vpack.i.b16 %v1390_v57, %v1389_v61  ;;  %v1395_v34 = vpack.i.b16 %v1383_v52, %v1349_v58  ;;  %v1397_v4 = vshrl.u32 %v1349_v58, 16  ;;  %v1411_v5 = vpack.i.b16 %v1384_v56, %v1350_v59 }
 0x36b   : > { %v1407_v7 = vpack.i.b16 %v1406_v0, %v1405_v1  ;;  %v1413_v8 = vshrl.u32 %v1350_v59, 16  ;;  %v1417_v11 = vcombine.low %v1387_v60, %v1403_v55  ;;  %v4284_v55 = vld [vmem:[#allocation4 + $0x8] sm:$0xff] }
 0x36c   : > { %v1399_v12 = vpack.i.b16 %v1398_v63, %v1397_v4  ;;  %v1425_v13 = vcombine.low %v1395_v34, %v1411_v5  ;;  %v4282_v63 = vld [vmem:[#allocation4] sm:$0xff] }
 0x36d   : > { %v1415_v62 = vpack.i.b16 %v1414_v6, %v1413_v8  ;;  %v1442_v14 = vcombine.low %v1391_v2, %v1407_v7  ;;  %v1424_v42 = vrot.slane %v1417_v11, %v4214_v36  ;;  %v4302_v6 = vld [vmem:[#allocation4 + $0x10] sm:$0xff]  ;;  %v4304_v8 = vld [vmem:[#allocation4 + $0x18] sm:$0xff] }
 0x36e   : > { %v1432_v30 = vrot.slane %v1425_v13, %v4214_v36 }
 0x36f   : > { %v1450_v16 = vcombine.low %v1399_v12, %v1415_v62  ;;  %v1449_v18 = vrot.slane %v1442_v14, %v4214_v36 }
 0x370   : > { %v1433_v9 = vcombine.low %v1424_v42, %v1432_v30  ;;  %v1497_v42 = vld [vmem:[#allocation3] sm:$0xf] }
 0x371   : > { %v1457_v19 = vrot.slane %v1450_v16, %v4214_v36  ;;  %v1814_v30 = vsel %vm1812_vm7, %v1497_v42, 0  ;;  %v1498_v16 = vld [vmem:[#allocation3 + $0x8] sm:$0xf] }
 0x372   : > { %v1440_v20 = vrot.slane %v1433_v9, %v4217_v40  ;;  %v1860_v9 = vsel %vm1812_vm7, %v1498_v16, 0 }
 0x373   : > { %v1458_v21 = vcombine.low %v1449_v18, %v1457_v19 }
 0x374   : > { %v1470_v26 = vshrl.u32 %v1440_v20, 16  ;;  %v1441_v31 = vcombine.high %v1440_v20, %v3744_v17 }
 0x375   : > { %v1465_v23 = vrot.slane %v1458_v21, %v4217_v40 }
 0x376   : > { %v1476_v35 = vshrl.u32 %v1441_v31, 16 }
 0x377   : > { %v4236_v3 = vpack.i.b16 %v1465_v23, %v1440_v20  ;;  %v1471_v27 = vshrl.u32 %v1465_v23, 16  ;;  %v1466_v29 = vcombine.high %v1465_v23, %v3744_v17 }
 0x379   : > { %3106 = vmatmul.mubr.msk.bf16.vlgmr.msra.gmra.mxu1 %vm1488_vm5, %v4236_v3  ;;  %v4241_v10 = vpack.i.b16 %v1471_v27, %v1470_v26  ;;  %v1477_v32 = vshrl.u32 %v1466_v29, 16  ;;  %v4254_v33 = vpack.i.b16 %v1466_v29, %v1441_v31  ;;  %v1499_v31 = vld [vmem:[#allocation3 + $0x10] sm:$0xf] }
 0x37a   : > { %3116 = vmatpush3.bf16.xpose.msra.mxu1 %v1597_v25  ;;  %3117 = vmatprep.mubr.msk.bf16.mxu1 %vm3743_vm3, %v3742_v15 }
 0x37b   : > { %3112 = vmatmul.mubr.msk.bf16.vlgmr.msra.gmra.mxu0 %vm1488_vm5, %v4241_v10  ;;  %3127 = vmatprep.subr.bf16.mxu1 %v3742_v15  ;;  %v4258_v37 = vpack.i.b16 %v1477_v32, %v1476_v35  ;;  %v1500_v35 = vld [vmem:[#allocation3 + $0x18] sm:$0xf] }
 0x37c   : > { %3122 = vmatpush3.bf16.xpose.msra.mxu0 %v1643_v28  ;;  %3123 = vmatprep.mubr.msk.bf16.mxu0 %vm3743_vm3, %v3742_v15 }
 0x37d   : > { %3133 = vmatprep.subr.bf16.mxu0 %v3742_v15 }
 0x381   : > { %3118 = vmatmul.mubr.msk.bf16.vlgmr.msra.gmra.mxu1 %vm1488_vm5, %v4254_v33 }
 0x382   : > { %3129 = vmatprep.mubr.msk.bf16.mxu1 %vm3743_vm3, %v3742_v15  ;;  %3128 = vmatpush3.bf16.msra.mxu1 %v1814_v30 }
 0x383   : > { %3124 = vmatmul.mubr.msk.bf16.vlgmr.msra.gmra.mxu0 %vm1488_vm5, %v4258_v37  ;;  %3139 = vmatprep.subr.bf16.mxu1 %v3742_v15 }
 0x384   : > { %3135 = vmatprep.mubr.msk.bf16.mxu0 %vm3743_vm3, %v3742_v15  ;;  %3134 = vmatpush3.bf16.msra.mxu0 %v1860_v9 }
 0x385   : > { %3145 = vmatprep.subr.bf16.mxu0 %v3742_v15 }
 0x439   : > { %v1541_v39 = vpop.f32.mrf.mxu1 }
 0x43a   : > { %v1689_v41 = vsel %vm1488_vm5, %v1541_v39, -inf }
 0x43b   : > { %1690 = vmax.xlane.f32.xlu1 %v1689_v41  ;;  %v3107_v43 = vpop.f32.mrf.mxu1  ;;  %v1587_v44 = vpop.f32.mrf.mxu0 }
 0x43c   : > { %v1692_v45 = vsel %vm1488_vm5, %v1587_v44, -inf }
 0x43d   : > { %v1544_v46 = vpop.f32.mrf.mxu1  ;;  %1693 = vmax.xlane.f32.xlu0 %v1692_v45  ;;  %v3113_v47 = vpop.f32.mrf.mxu0  ;;  %v2006_v45 = vld [vmem:[#allocation2 + $0x4] sm:$0xf] }
 0x43f   : > { %v3108_v48 = vpop.f32.mrf.mxu1  ;;  %v1590_v49 = vpop.f32.mrf.mxu0 }
 0x440   : > { %v2015_v48 = vsel %vm1488_vm5, %v2006_v45, 0  ;;  %v2007_v49 = vld [vmem:[#allocation2 + $0xc] sm:$0xf] }
 0x441   : > { %v3114_v50 = vpop.f32.mrf.mxu0  ;;  %v1633_v51 = vpop.f32.mrf.mxu1 }
 0x442   : > { %v1695_v52 = vsel %vm1488_vm5, %v1633_v51, -inf }
 0x443   : > { %v3119_v53 = vpop.f32.mrf.mxu1  ;;  %1696 = vmax.xlane.f32.xlu0 %v1695_v52  ;;  %v1679_v54 = vpop.f32.mrf.mxu0  ;;  %v2058_v52 = vsel %vm1488_vm5, %v2007_v49, 0 }
 0x444   : > { %v1698_v56 = vsel %vm1488_vm5, %v1679_v54, -inf  ;;  %v2008_v53 = vld [vmem:[#allocation2 + $0x14] sm:$0xf] }
 0x445   : > { %v1636_v57 = vpop.f32.mrf.mxu1  ;;  %1699 = vmax.xlane.f32.xlu1 %v1698_v56  ;;  %v3125_v58 = vpop.f32.mrf.mxu0  ;;  %v2009_v56 = vld [vmem:[#allocation2 + $0x1c] sm:$0xf] }
 0x446   : > { %v2144_v57 = vsel %vm1488_vm5, %v2009_v56, 0 }
 0x447   : > { %v3120_v59 = vpop.f32.mrf.mxu1  ;;  %v1682_v60 = vpop.f32.mrf.mxu0 }
 0x449   : > { %v3126_v61 = vpop.f32.mrf.mxu0 }
 0x4c4   : > { %v1691_v0 = vpop.xlane.xlu1 %1690 }
 0x4c5   : > { %v4287_v1 = vmax.f32 %v4282_v63, %v1691_v0 }
 0x4c6   : > { %v1694_v2 = vpop.xlane.xlu0 %1693 }
 0x4c7   : > { %v1705_v34 = vsub.f32 %v4282_v63, %v4287_v1  ;;  %2002 = vst.msk [vmem:[#allocation4] sm:$0xff] %vm1479_vm6, %v4287_v1  ;;  %v4294_v4 = vmax.f32 %v4284_v55, %v1694_v2  ;;  %1719 = vperm.xlu0 %3382, %v4287_v1  }
 0x4c9   : > { %v1706_v5 = vsub.f32 %v4284_v55, %v4294_v4  ;;  %2003 = vst.msk [vmem:[#allocation4 + $0x8] sm:$0xff] %vm1479_vm6, %v4294_v4  ;;  %1724 = vperm.xlu1 %3383, %v4294_v4  }
 0x4cc   : > { %v1697_v7 = vpop.xlane.xlu0 %1696 }
 0x4cd   : > { %v4307_v11 = vmax.f32 %v4302_v6, %v1697_v7 }
 0x4ce   : > { %v1700_v12 = vpop.xlane.xlu1 %1699 }
 0x4cf   : > { %v1707_v13 = vsub.f32 %v4302_v6, %v4307_v11  ;;  %2004 = vst.msk [vmem:[#allocation4 + $0x10] sm:$0xff] %vm1479_vm6, %v4307_v11  ;;  %v4314_v62 = vmax.f32 %v4304_v8, %v1700_v12  ;;  %1729 = vperm.xlu1 %3383, %v4307_v11  }
 0x4d1   : > { %v1708_v14 = vsub.f32 %v4304_v8, %v4314_v62  ;;  %2005 = vst.msk [vmem:[#allocation4 + $0x18] sm:$0xff] %vm1479_vm6, %v4314_v62  ;;  %v1713_v55 = vmul.f32 1.442695, %v1707_v13  ;;  %v1750_v8 = vld [vmem:[#allocation5 + $0x8] sm:$0xff] }
 0x4d3   : > { %1734 = vperm.xlu1 %3383, %v4314_v62   ;;  %v1715_v4 = vmul.f32 1.442695, %v1708_v14 }
 0x542   : > { %v1720_v18 = vpop.permute.xlu0 %1719 }
 0x543   : > { %v1737_v19 = vsub.f32 %v1541_v39, %v1720_v18  ;;  %v1906_v39 = vsel %vm1812_vm7, %v1499_v31, 0 }
 0x544   : > { %v1725_v20 = vpop.permute.xlu1 %1724 }
 0x545   : > { %v1741_v21 = vmul.f32 1.442695, %v1737_v19  ;;  %v1738_v22 = vsub.f32 %v1587_v44, %v1725_v20  ;;  %v1952_v44 = vsel %vm1812_vm7, %v1500_v35, 0 }
 0x547   : > { %3388 = vpow2.f32 %v1741_v21  ;;  %v1743_v23 = vmul.f32 1.442695, %v1738_v22 }
 0x549   : > { %3390 = vpow2.f32 %v1743_v23 }
 0x54a   : > { %v1730_v24 = vpop.permute.xlu1 %1729 }
 0x54b   : > { %v1739_v25 = vsub.f32 %v1633_v51, %v1730_v24 }
 0x54d   : > { %v1745_v26 = vmul.f32 1.442695, %v1739_v25 }
 0x54e   : > { %v1735_v27 = vpop.permute.xlu1 %1734 }
 0x54f   : > { %3392 = vpow2.f32 %v1745_v26  ;;  %v1740_v28 = vsub.f32 %v1679_v54, %v1735_v27  ;;  %v2101_v54 = vsel %vm1488_vm5, %v2008_v53, 0  ;;  %v4413_v53 = vld [vmem:[#allocation4 + $0x8] sm:$0xff] }
 0x551   : > { %v1747_v29 = vmul.f32 1.442695, %v1740_v28 }
 0x553   : > { %3394 = vpow2.f32 %v1747_v29 }
 0x554   : > { %v4326_v32 = vpop.eup %3388 }
 0x555   : > { %v1805_v38 = vpack.c.bf16 %v4326_v32, %v4326_v32 }
 0x556   : > { %v4331_v41 = vpop.eup %3390 }
 0x557   : > { %3130 = vmatmul.mubr.msk.bf16.vlgmr.msra.gmra.mxu1 %vm1488_vm5, %v1805_v38  ;;  %v1806_v43 = vpack.c.bf16 %v4331_v41, %v4331_v41 }
 0x558   : > { %3140 = vmatpush3.bf16.msra.mxu1 %v1906_v39  ;;  %3141 = vmatprep.mubr.msk.bf16.mxu1 %vm3743_vm3, %v3742_v15 }
 0x559   : > { %3136 = vmatmul.mubr.msk.bf16.vlgmr.msra.gmra.mxu0 %vm1488_vm5, %v1806_v43  ;;  %3151 = vmatprep.subr.bf16.mxu1 %v3742_v15 }
 0x55a   : > { %3146 = vmatpush3.bf16.msra.mxu0 %v1952_v44  ;;  %3147 = vmatprep.mubr.msk.bf16.mxu0 %vm3743_vm3, %v3742_v15 }
 0x55b   : > { %3157 = vmatprep.subr.bf16.mxu0 %v3742_v15 }
 0x55c   : > { %v4344_v46 = vpop.eup %3392 }
 0x55d   : > { %v1807_v47 = vpack.c.bf16 %v4344_v46, %v4344_v46 }
 0x55f   : > { %3142 = vmatmul.mubr.msk.bf16.vlgmr.msra.gmra.mxu1 %vm1488_vm5, %v1807_v47 }
 0x560   : > { %v4350_v50 = vpop.eup %3394  ;;  %3152 = vmatpush3.bf16.xpose.msra.mxu1 %v2015_v48  ;;  %3153 = vmatprep.mubr.msk.bf16.mxu1 %vm3743_vm3, %v3742_v15  ;;  %v4403_v48 = vld [vmem:[#allocation4] sm:$0xff] }
 0x561   : > { %v1808_v51 = vpack.c.bf16 %v4350_v50, %v4350_v50  ;;  %3163 = vmatprep.subr.bf16.mxu1 %v3742_v15 }
 0x563   : > { %3148 = vmatmul.mubr.msk.bf16.vlgmr.msra.gmra.mxu0 %vm1488_vm5, %v1808_v51 }
 0x564   : > { %3158 = vmatpush3.bf16.xpose.msra.mxu0 %v2058_v52  ;;  %3159 = vmatprep.mubr.msk.bf16.mxu0 %vm3743_vm3, %v3742_v15 }
 0x565   : > { %3169 = vmatprep.subr.bf16.mxu0 %v3742_v15 }
 0x567   : > { %3154 = vmatmul.mubr.msk.bf16.vlgmr.msra.gmra.mxu1 %vm1488_vm5, %v4236_v3 }
 0x568   : > { %3164 = vmatpush3.bf16.xpose.msra.mxu1 %v2101_v54  ;;  %3165 = vmatprep.mubr.msk.bf16.mxu1 %vm3743_vm3, %v3742_v15 }
 0x569   : > { %3175 = vmatprep.subr.bf16.mxu1 %v3742_v15 }
 0x56b   : > { %3160 = vmatmul.mubr.msk.bf16.vlgmr.msra.gmra.mxu0 %vm1488_vm5, %v4241_v10 }
 0x56c   : > { %3170 = vmatpush3.bf16.xpose.msra.mxu0 %v2144_v57  ;;  %3171 = vmatprep.mubr.msk.bf16.mxu0 %vm3743_vm3, %v3742_v15 }
 0x56d   : > { %3181 = vmatprep.subr.bf16.mxu0 %v3742_v15 }
 0x56f   : > { %3166 = vmatmul.mubr.msk.bf16.vlgmr.msra.gmra.mxu1 %vm1488_vm5, %v4254_v33 }
 0x570   : > { %3177 = vmatprep.mubr.msk.bf16.mxu1 %vm3743_vm3, %v3742_v15 }
 0x573   : > { %3172 = vmatmul.mubr.msk.bf16.vlgmr.msra.gmra.mxu0 %vm1488_vm5, %v4258_v37 }
 0x574   : > { %3183 = vmatprep.mubr.msk.bf16.mxu0 %vm3743_vm3, %v3742_v15 }
 0x617   : > { %v4382_v3 = vpop.f32.mrf.mxu1 }
 0x619   : > { %v3131_v10 = vpop.f32.mrf.mxu1  ;;  %v4384_v58 = vpop.f32.mrf.mxu0 }
 0x61a   : > { %v4423_v10 = vld [vmem:[#allocation4 + $0x10] sm:$0xff] }
 0x61b   : > { %v1853_v59 = vpop.f32.mrf.mxu1  ;;  %v3137_v60 = vpop.f32.mrf.mxu0 }
 0x61d   : > { %v3132_v61 = vpop.f32.mrf.mxu1  ;;  %v1899_v0 = vpop.f32.mrf.mxu0 }
 0x61e   : > { %v4433_v0 = vld [vmem:[#allocation4 + $0x18] sm:$0xff] }
 0x61f   : > { %v3138_v2 = vpop.f32.mrf.mxu0  ;;  %v4386_v33 = vpop.f32.mrf.mxu1 }
 0x621   : > { %v3143_v7 = vpop.f32.mrf.mxu1 }
 0x623   : > { %v1945_v12 = vpop.f32.mrf.mxu1  ;;  %v4388_v42 = vpop.f32.mrf.mxu0 }
 0x624   : > { %v2010_v12 = vld [vmem:[#allocation3 + $0x4] sm:$0xf] }
 0x625   : > { %v3144_v37 = vpop.f32.mrf.mxu1  ;;  %v3149_v30 = vpop.f32.mrf.mxu0 }
 0x626   : > { %v2314_v30 = vsel %vm1812_vm7, %v2010_v12, 0 }
 0x627   : > { %v1991_v16 = vpop.f32.mrf.mxu0  ;;  %v4390_v9 = vpop.f32.mrf.mxu1  ;;  %3176 = vmatpush3.bf16.msra.mxu1 %v2314_v30  ;;  %v1711_v30 = vmul.f32 1.442695, %v1706_v5 }
 0x628   : > { %v2190_v18 = vsel %vm1488_vm5, %v4390_v9, -inf  ;;  %3187 = vmatprep.subr.bf16.mxu1 %v3742_v15  ;;  %v2011_v16 = vld [vmem:[#allocation3 + $0xc] sm:$0xf] }
 0x629   : > { %2191 = vmax.xlane.f32.xlu1 %v2190_v18  ;;  %v3150_v19 = vpop.f32.mrf.mxu0  ;;  %v3155_v20 = vpop.f32.mrf.mxu1  ;;  %v2360_v18 = vsel %vm1812_vm7, %v2011_v16, 0 }
 0x62a   : > { %3182 = vmatpush3.bf16.msra.mxu0 %v2360_v18  ;;  %v1760_v19 = vsel %vm1488_vm5, %v4331_v41, 0.0  ;;  %v1763_v20 = vsel %vm1488_vm5, %v4344_v46, 0.0  ;;  %v1709_v18 = vmul.f32 1.442695, %v1705_v34 }
 0x62b   : > { %v2054_v21 = vpop.f32.mrf.mxu1  ;;  %v4394_v22 = vpop.f32.mrf.mxu0  ;;  %3193 = vmatprep.subr.bf16.mxu0 %v3742_v15 }
 0x62c   : > { %v2193_v23 = vsel %vm1488_vm5, %v4394_v22, -inf  ;;  %v1757_v21 = vsel %vm1488_vm5, %v4326_v32, 0.0 }
 0x62d   : > { %v3156_v24 = vpop.f32.mrf.mxu1  ;;  %2194 = vmax.xlane.f32.xlu0 %v2193_v23  ;;  %v3161_v25 = vpop.f32.mrf.mxu0  ;;  %v1766_v23 = vsel %vm1488_vm5, %v4350_v50, 0.0  ;;  %v2012_v50 = vld [vmem:[#allocation3 + $0x14] sm:$0xf] }
 0x62f   : > { %v2097_v26 = vpop.f32.mrf.mxu0  ;;  %v4398_v27 = vpop.f32.mrf.mxu1 }
 0x630   : > { %v2196_v28 = vsel %vm1488_vm5, %v4398_v27, -inf }
 0x631   : > { %2197 = vmax.xlane.f32.xlu1 %v2196_v28  ;;  %v3162_v29 = vpop.f32.mrf.mxu0  ;;  %v3167_v31 = vpop.f32.mrf.mxu1 }
 0x633   : > { %v2140_v35 = vpop.f32.mrf.mxu1  ;;  %v2180_v38 = vpop.f32.mrf.mxu0 }
 0x634   : > { %v2199_v39 = vsel %vm1488_vm5, %v2180_v38, -inf }
 0x635   : > { %v3168_v43 = vpop.f32.mrf.mxu1  ;;  %2200 = vmax.xlane.f32.xlu1 %v2199_v39  ;;  %v3173_v44 = vpop.f32.mrf.mxu0 }
 0x637   : > { %v2183_v45 = vpop.f32.mrf.mxu0 }
 0x639   : > { %v3174_v47 = vpop.f32.mrf.mxu0 }
 0x63a   : > { %v2406_v47 = vsel %vm1812_vm7, %v2012_v50, 0 }
 0x6b2   : > { %v2192_v49 = vpop.xlane.xlu1 %2191 }
 0x6b3   : > { %v4406_v51 = vmax.f32 %v4403_v48, %v2192_v49 }
 0x6b5   : > { %v2206_v52 = vsub.f32 %v4403_v48, %v4406_v51  ;;  %2502 = vst.msk [vmem:[#allocation4] sm:$0xff] %vm1479_vm6, %v4406_v51  ;;  %2220 = vperm.xlu1 %3383, %v4406_v51   ;;  %v1751_v48 = vld [vmem:[#allocation5 + $0x10] sm:$0xff] }
 0x6b6   : > { %v2195_v54 = vpop.xlane.xlu0 %2194 }
 0x6b7   : > { %v4416_v56 = vmax.f32 %v4413_v53, %v2195_v54  ;;  %v2210_v63 = vmul.f32 1.442695, %v2206_v52 }
 0x6b9   : > { %v2207_v57 = vsub.f32 %v4413_v53, %v4416_v56  ;;  %2503 = vst.msk [vmem:[#allocation4 + $0x8] sm:$0xff] %vm1479_vm6, %v4416_v56  ;;  %2225 = vperm.xlu0 %3382, %v4416_v56  }
 0x6ba   : > { %v2198_v59 = vpop.xlane.xlu1 %2197 }
 0x6bb   : > { %v4426_v60 = vmax.f32 %v4423_v10, %v2198_v59  ;;  %v2212_v1 = vmul.f32 1.442695, %v2207_v57 }
 0x6bd   : > { %v2208_v61 = vsub.f32 %v4423_v10, %v4426_v60  ;;  %2504 = vst.msk [vmem:[#allocation4 + $0x10] sm:$0xff] %vm1479_vm6, %v4426_v60  ;;  %2230 = vperm.xlu1 %3383, %v4426_v60  }
 0x6be   : > { %v2201_v2 = vpop.xlane.xlu1 %2200 }
 0x6bf   : > { %v4436_v7 = vmax.f32 %v4433_v0, %v2201_v2  ;;  %v2214_v34 = vmul.f32 1.442695, %v2208_v61  ;;  %v1749_v61 = vld [vmem:[#allocation5] sm:$0xff] }
 0x6c1   : > { %v2209_v37 = vsub.f32 %v4433_v0, %v4436_v7  ;;  %2505 = vst.msk [vmem:[#allocation4 + $0x18] sm:$0xff] %vm1479_vm6, %v4436_v7  ;;  %2235 = vperm.xlu1 %3383, %v4436_v7  }
 0x6c3   : > { %v2216_v5 = vmul.f32 1.442695, %v2209_v37 }
 0x6d8   : > { %1761 = vadd.xlane.f32.xlu0 %v1760_v19 }
 0x6dc   : > { %1764 = vadd.xlane.f32.xlu0 %v1763_v20 }
 0x6e5   : > { %1758 = vadd.xlane.f32.xlu1 %v1757_v21 }
 0x6e9   : > { %1767 = vadd.xlane.f32.xlu1 %v1766_v23  ;;  %v1752_v23 = vld [vmem:[#allocation5 + $0x18] sm:$0xff] }
 0x730   : > { %v2221_v24 = vpop.permute.xlu1 %2220 }
 0x731   : > { %v2238_v25 = vsub.f32 %v4390_v9, %v2221_v24 }
 0x733   : > { %v2242_v26 = vmul.f32 1.442695, %v2238_v25 }
 0x734   : > { %v2226_v28 = vpop.permute.xlu0 %2225 }
 0x735   : > { %3396 = vpow2.f32 %v2242_v26  ;;  %v2239_v41 = vsub.f32 %v4394_v22, %v2226_v28  ;;  %v2013_v22 = vld [vmem:[#allocation3 + $0x1c] sm:$0xf] }
 0x736   : > { %v2452_v54 = vsel %vm1812_vm7, %v2013_v22, 0 }
 0x737   : > { %v2244_v29 = vmul.f32 1.442695, %v2239_v41 }
 0x738   : > { %v2231_v31 = vpop.permute.xlu1 %2230 }
 0x739   : > { %3398 = vpow2.f32 %v2244_v29  ;;  %v2240_v46 = vsub.f32 %v4398_v27, %v2231_v31 }
 0x73b   : > { %v2246_v35 = vmul.f32 1.442695, %v2240_v46 }
 0x73c   : > { %v2236_v32 = vpop.permute.xlu1 %2235 }
 0x73d   : > { %3400 = vpow2.f32 %v2246_v35  ;;  %v2241_v39 = vsub.f32 %v2180_v38, %v2236_v32 }
 0x73f   : > { %v2248_v43 = vmul.f32 1.442695, %v2241_v39 }
 0x741   : > { %3402 = vpow2.f32 %v2248_v43 }
 0x742   : > { %v3397_v44 = vpop.eup %3396  ;;  %3404 = vpow2.f32 %v1711_v30 }
 0x743   : > { %v2258_v9 = vsel %vm1488_vm5, %v3397_v44, 0.0  ;;  %v2306_v45 = vpack.c.bf16 %v3397_v44, %v3397_v44  ;;  %3406 = vpow2.f32 %v1709_v18 }
 0x744   : > { %2259 = vadd.xlane.f32.xlu0 %v2258_v9  ;;  %3408 = vpow2.f32 %v1713_v55 }
 0x745   : > { %3178 = vmatmul.mubr.msk.bf16.vlgmr.msra.gmra.mxu1 %vm1488_vm5, %v2306_v45  ;;  %3410 = vpow2.f32 %v1715_v4 }
 0x746   : > { %v3399_v49 = vpop.eup %3398  ;;  %3188 = vmatpush3.bf16.msra.mxu1 %v2406_v47  ;;  %3189 = vmatprep.mubr.msk.bf16.mxu1 %vm3743_vm3, %v3742_v15  ;;  %3412 = vpow2.f32 %v2210_v63 }
 0x747   : > { %v2261_v27 = vsel %vm1488_vm5, %v3399_v49, 0.0  ;;  %v2307_v38 = vpack.c.bf16 %v3399_v49, %v3399_v49  ;;  %3199 = vmatprep.subr.bf16.mxu1 %v3742_v15  ;;  %3414 = vpow2.f32 %v2212_v1 }
 0x748   : > { %2262 = vadd.xlane.f32.xlu1 %v2261_v27  ;;  %3416 = vpow2.f32 %v2214_v34 }
 0x749   : > { %3184 = vmatmul.mubr.msk.bf16.vlgmr.msra.gmra.mxu0 %vm1488_vm5, %v2307_v38  ;;  %3418 = vpow2.f32 %v2216_v5 }
 0x74a   : > { %v3401_v59 = vpop.eup %3400  ;;  %3194 = vmatpush3.bf16.msra.mxu0 %v2452_v54  ;;  %3195 = vmatprep.mubr.msk.bf16.mxu0 %vm3743_vm3, %v3742_v15  ;;  %v1777_v54 = vld [vmem:[#allocation6] sm:$0xff] }
 0x74b   : > { %v2264_v2 = vsel %vm1488_vm5, %v3401_v59, 0.0  ;;  %v2308_v12 = vpack.c.bf16 %v3401_v59, %v3401_v59  ;;  %v1778_v59 = vld [vmem:[#allocation6 + $0x8] sm:$0xff] }
 0x74c   : > { %2265 = vadd.xlane.f32.xlu0 %v2264_v2 }
 0x74d   : > { %3190 = vmatmul.mubr.msk.bf16.vlgmr.msra.gmra.mxu1 %vm1488_vm5, %v2308_v12 }
 0x74e   : > { %v3403_v16 = vpop.eup %3402  ;;  %3203 = vmatprep.mubr.msk.bf16.mxu1 %vm3743_vm3, %v3742_v15 }
 0x74f   : > { %v2267_v19 = vsel %vm1488_vm5, %v3403_v16, 0.0  ;;  %v2309_v20 = vpack.c.bf16 %v3403_v16, %v3403_v16  ;;  %v3405_v6 = vpop.eup %3404 }
 0x750   : > { %2268 = vadd.xlane.f32.xlu1 %v2267_v19  ;;  %v3407_v11 = vpop.eup %3406  ;;  %v1754_v13 = vmul.f32 %v3405_v6, %v1750_v8  ;;  %v1780_v19 = vld [vmem:[#allocation6 + $0x18] sm:$0xff] }
 0x751   : > { %3196 = vmatmul.mubr.msk.bf16.vlgmr.msra.gmra.mxu0 %vm1488_vm5, %v2309_v20  ;;  %v3409_v62 = vpop.eup %3408  ;;  %v1753_v37 = vmul.f32 %v3407_v11, %v1749_v61  ;;  %v1779_v20 = vld [vmem:[#allocation6 + $0x10] sm:$0xff] }
 0x752   : > { %v1755_v52 = vmul.f32 %v3409_v62, %v1751_v48  ;;  %v3411_v53 = vpop.eup %3410 }
 0x753   : > { %v3413_v10 = vpop.eup %3412  ;;  %v1756_v25 = vmul.f32 %v3411_v53, %v1752_v23 }
 0x754   : > { %v3415_v60 = vpop.eup %3414 }
 0x755   : > { %v3417_v0 = vpop.eup %3416 }
 0x756   : > { %v3419_v7 = vpop.eup %3418 }
 0x761   : > { %v1762_v14 = vpop.xlane.xlu0 %1761  ;;  %1788 = vperm.xlu1 %3383, %v3405_v6  }
 0x762   : > { %v1770_v51 = vadd.f32 %v1762_v14, %v1754_v13  ;;  %1783 = vperm.xlu0 %3382, %v3407_v11  }
 0x764   : > { %1774 = vst.msk [vmem:[#allocation5 + $0x8] sm:$0xff] %vm1479_vm6, %v1770_v51 }
 0x765   : > { %v1765_v56 = vpop.xlane.xlu0 %1764  ;;  %1793 = vperm.xlu1 %3383, %v3409_v62  }
 0x766   : > { %v1771_v57 = vadd.f32 %v1765_v56, %v1755_v52  ;;  %1798 = vperm.xlu0 %3382, %v3411_v53  }
 0x768   : > { %1775 = vst.msk [vmem:[#allocation5 + $0x10] sm:$0xff] %vm1479_vm6, %v1771_v57 }
 0x769   : > { %2284 = vperm.xlu1 %3383, %v3413_v10  }
 0x76a   : > { %2289 = vperm.xlu0 %3382, %v3415_v60  }
 0x76b   : > { %v2251_v46 = vld [vmem:[#allocation5 + $0x8] sm:$0xff] }
 0x76c   : > { %v2255_v32 = vmul.f32 %v3415_v60, %v2251_v46 }
 0x76d   : > { %2294 = vperm.xlu1 %3383, %v3417_v0  }
 0x76e   : > { %2299 = vperm.xlu0 %3382, %v3419_v7   ;;  %v1759_v21 = vpop.xlane.xlu1 %1758 }
 0x76f   : > { %v1769_v24 = vadd.f32 %v1759_v21, %v1753_v37  ;;  %v2252_v43 = vld [vmem:[#allocation5 + $0x10] sm:$0xff] }
 0x770   : > { %v2256_v44 = vmul.f32 %v3417_v0, %v2252_v43 }
 0x771   : > { %1773 = vst.msk [vmem:[#allocation5] sm:$0xff] %vm1479_vm6, %v1769_v24 }
 0x772   : > { %v1768_v26 = vpop.xlane.xlu1 %1767 }
 0x773   : > { %v1772_v28 = vadd.f32 %v1768_v26, %v1756_v25 }
 0x775   : > { %1776 = vst.msk [vmem:[#allocation5 + $0x18] sm:$0xff] %vm1479_vm6, %v1772_v28 }
 0x778   : > { %v2250_v41 = vld [vmem:[#allocation5] sm:$0xff] }
 0x779   : > { %v2254_v29 = vmul.f32 %v3413_v10, %v2250_v41 }
 0x77c   : > { %v2253_v45 = vld [vmem:[#allocation5 + $0x18] sm:$0xff] }
 0x77d   : > { %v2257_v49 = vmul.f32 %v3419_v7, %v2253_v45 }
 0x7cd   : > { %v2260_v31 = vpop.xlane.xlu0 %2259 }
 0x7ce   : > { %v2270_v35 = vadd.f32 %v2260_v31, %v2254_v29 }
 0x7d0   : > { %2274 = vst.msk [vmem:[#allocation5] sm:$0xff] %vm1479_vm6, %v2270_v35 }
 0x7d1   : > { %v2263_v39 = vpop.xlane.xlu1 %2262 }
 0x7d2   : > { %v2271_v50 = vadd.f32 %v2263_v39, %v2255_v32  ;;  %v3386_v32 = vld [vmem:[#allocation16 + $0x8] sm:$0xff]  }
 0x7d3   : > { %3200 = vmatpush3.bf16.msra.mxu1 %v3386_v32  ;;  %v3387_v32 = vld [vmem:[#allocation16] sm:$0xff]  }
 0x7d4   : > { %2275 = vst.msk [vmem:[#allocation5 + $0x8] sm:$0xff] %vm1479_vm6, %v2271_v50  ;;  %3201 = vmatprep.subr.bf16.mxu1 %v3742_v15 }
 0x7d5   : > { %v2266_v9 = vpop.xlane.xlu0 %2265 }
 0x7d6   : > { %v2272_v47 = vadd.f32 %v2266_v9, %v2256_v44 }
 0x7d7   : > { %v2510_v22 = vld [vmem:[#allocation5] sm:$0xff]  ;;  %3202 = vmatpush3.bf16.msra.mxu1 %v3387_v32 }
 0x7d8   : > { %2276 = vst.msk [vmem:[#allocation5 + $0x10] sm:$0xff] %vm1479_vm6, %v2272_v47  ;;  %3420 = vrcp.f32 %v2510_v22 }
 0x7d9   : > { %v2269_v27 = vpop.xlane.xlu1 %2268 }
 0x7da   : > { %v2273_v38 = vadd.f32 %v2269_v27, %v2257_v49 }
 0x7db   : > { %v2511_v2 = vld [vmem:[#allocation5 + $0x8] sm:$0xff] }
 0x7dc   : > { %2277 = vst.msk [vmem:[#allocation5 + $0x18] sm:$0xff] %vm1479_vm6, %v2273_v38  ;;  %3422 = vrcp.f32 %v2511_v2 }
 0x7dd   : > { %v1784_v12 = vpop.permute.xlu0 %1783  ;;  %v1789_v30 = vpop.permute.xlu1 %1788 }
 0x7de   : > { %v1801_v16 = vmul.f32 %v1784_v12, %v1777_v54  ;;  %v1802_v18 = vmul.f32 %v1789_v30, %v1778_v59 }
 0x7df   : > { %v2512_v55 = vld [vmem:[#allocation5 + $0x10] sm:$0xff] }
 0x7e0   : > { %v1994_v4 = vadd.f32 %v4382_v3, %v1801_v16  ;;  %v1995_v63 = vadd.f32 %v4384_v58, %v1802_v18  ;;  %3424 = vrcp.f32 %v2512_v55 }
 0x7e1   : > { %v1799_v1 = vpop.permute.xlu0 %1798  ;;  %v1794_v34 = vpop.permute.xlu1 %1793 }
 0x7e2   : > { %1998 = vst.msk [vmem:[#allocation6] sm:$0xff] %vm1488_vm5, %v1994_v4  ;;  %1999 = vst.msk [vmem:[#allocation6 + $0x8] sm:$0xff] %vm1488_vm5, %v1995_v63  ;;  %v1804_v5 = vmul.f32 %v1799_v1, %v1780_v19  ;;  %v1803_v6 = vmul.f32 %v1794_v34, %v1779_v20 }
 0x7e3   : > { %v2513_v8 = vld [vmem:[#allocation5 + $0x18] sm:$0xff] }
 0x7e4   : > { %v1997_v11 = vadd.f32 %v4388_v42, %v1804_v5  ;;  %v1996_v13 = vadd.f32 %v4386_v33, %v1803_v6  ;;  %3426 = vrcp.f32 %v2513_v8 }
 0x7e5   : > { %v3421_v62 = vpop.eup %3420  ;;  %v2285_v51 = vpop.permute.xlu1 %2284 }
 0x7e6   : > { %2001 = vst.msk [vmem:[#allocation6 + $0x18] sm:$0xff] %vm1488_vm5, %v1997_v11  ;;  %2000 = vst.msk [vmem:[#allocation6 + $0x10] sm:$0xff] %vm1488_vm5, %v1996_v13  ;;  %2520 = vperm.xlu1 %3383, %v3421_v62   ;;  %v2290_v33 = vpop.permute.xlu0 %2289 }
 0x7e9   : > { %v3423_v3 = vpop.eup %3422  ;;  %v2278_v48 = vld [vmem:[#allocation6] sm:$0xff]  ;;  %v2279_v53 = vld [vmem:[#allocation6 + $0x8] sm:$0xff]  ;;  %v2295_v7 = vpop.permute.xlu1 %2294 }
 0x7ea   : > { %2525 = vperm.xlu0 %3382, %v3423_v3   ;;  %v2302_v52 = vmul.f32 %v2285_v51, %v2278_v48  ;;  %v2303_v10 = vmul.f32 %v2290_v33, %v2279_v53  ;;  %v2300_v41 = vpop.permute.xlu0 %2299 }
 0x7ed   : > { %v3425_v58 = vpop.eup %3424  ;;  %v2280_v60 = vld [vmem:[#allocation6 + $0x10] sm:$0xff]  ;;  %v2281_v25 = vld [vmem:[#allocation6 + $0x18] sm:$0xff] }
 0x7ee   : > { %2530 = vperm.xlu1 %3383, %v3425_v58   ;;  %v2304_v24 = vmul.f32 %v2295_v7, %v2280_v60  ;;  %v2305_v35 = vmul.f32 %v2300_v41, %v2281_v25 }
 0x7f1   : > { %v3427_v14 = vpop.eup %3426 }
 0x7f2   : > { %2535 = vperm.xlu0 %3382, %v3427_v14  }
 0x805   : > { %v2350_v42 = vpop.f32.mrf.mxu1 }
 0x806   : > { %v2494_v56 = vadd.f32 %v2350_v42, %v2302_v52 }
 0x807   : > { %v3179_v57 = vpop.f32.mrf.mxu1 }
 0x808   : > { %2498 = vst.msk [vmem:[#allocation6] sm:$0xff] %vm1488_vm5, %v2494_v56 }
 0x809   : > { %v2353_v61 = vpop.f32.mrf.mxu1  ;;  %v2396_v0 = vpop.f32.mrf.mxu0 }
 0x80a   : > { %v2495_v37 = vadd.f32 %v2396_v0, %v2303_v10 }
 0x80b   : > { %v3180_v21 = vpop.f32.mrf.mxu1  ;;  %v3185_v23 = vpop.f32.mrf.mxu0 }
 0x80c   : > { %2499 = vst.msk [vmem:[#allocation6 + $0x8] sm:$0xff] %vm1488_vm5, %v2495_v37 }
 0x80d   : > { %v2399_v26 = vpop.f32.mrf.mxu0  ;;  %v2442_v28 = vpop.f32.mrf.mxu1 }
 0x80e   : > { %v2496_v29 = vadd.f32 %v2442_v28, %v2304_v24 }
 0x80f   : > { %v3186_v31 = vpop.f32.mrf.mxu0  ;;  %v3191_v46 = vpop.f32.mrf.mxu1  ;;  %v2506_v49 = vld [vmem:[#allocation6] sm:$0xff] }
 0x810   : > { %2500 = vst.msk [vmem:[#allocation6 + $0x10] sm:$0xff] %vm1488_vm5, %v2496_v29 }
 0x811   : > { %v2445_v39 = vpop.f32.mrf.mxu1  ;;  %v2488_v43 = vpop.f32.mrf.mxu0 }
 0x812   : > { %v2497_v50 = vadd.f32 %v2488_v43, %v2305_v35 }
 0x813   : > { %v3192_v44 = vpop.f32.mrf.mxu1  ;;  %v3197_v9 = vpop.f32.mrf.mxu0  ;;  %v2507_v12 = vld [vmem:[#allocation6 + $0x8] sm:$0xff] }
 0x814   : > { %2501 = vst.msk [vmem:[#allocation6 + $0x18] sm:$0xff] %vm1488_vm5, %v2497_v50 }
 0x815   : > { %v2491_v45 = vpop.f32.mrf.mxu0 }
 0x817   : > { %v3198_v47 = vpop.f32.mrf.mxu0  ;;  %v2508_v54 = vld [vmem:[#allocation6 + $0x10] sm:$0xff] }
 0x81b   : > { %v2509_v20 = vld [vmem:[#allocation6 + $0x18] sm:$0xff] }
 0x861   : > { %v2521_v22 = vpop.permute.xlu1 %2520 }
 0x862   : > { %v2538_v27 = vmul.f32 %v2521_v22, %v2506_v49 }
 0x864   : > { %v2542_v2 = vpack.c.bf16 %v2538_v27, %v2538_v27 }
 0x865   : > { %v2526_v38 = vpop.permute.xlu0 %2525 }
 0x866   : > { %v2539_v16 = vmul.f32 %v2526_v38, %v2507_v12  ;;  %v2549_v55 = vrot.slane %v2542_v2, %v4214_v36 }
 0x868   : > { %v2576_v63 = vpack.c.bf16 %v2539_v16, %v2539_v16 }
 0x869   : > { %v2531_v59 = vpop.permute.xlu1 %2530 }
 0x86a   : > { %v2540_v30 = vmul.f32 %v2531_v59, %v2508_v54  ;;  %v2583_v11 = vrot.slane %v2576_v63, %v4214_v36 }
 0x86c   : > { %v2550_v18 = vpack.c.bf16 %v2540_v30, %v2540_v30 }
 0x86d   : > { %v2536_v19 = vpop.permute.xlu0 %2535 }
 0x86e   : > { %v2557_v15 = vrot.slane %v2550_v18, %v4214_v36  ;;  %v2541_v4 = vmul.f32 %v2536_v19, %v2509_v20 }
 0x870   : > { %v2558_v1 = vcombine.low %v2549_v55, %v2557_v15  ;;  %v2559_v34 = vcombine.high %v2549_v55, %v2557_v15  ;;  %v2584_v5 = vpack.c.bf16 %v2541_v4, %v2541_v4  ;;  %v3025_v55 = vld [vmem:[%s4682_s12] ss:$0 sm:$0xff] }
 0x872   : > { %v2566_v6 = vrot.slane %v2558_v1, %v4217_v40  ;;  %v2591_v8 = vrot.slane %v2584_v5, %v4214_v36  ;;  %v2573_v13 = vrot.slane %v2559_v34, %v4217_v40 }
 0x874   : > { %v2592_v62 = vcombine.low %v2583_v11, %v2591_v8  ;;  %v2593_v3 = vcombine.high %v2583_v11, %v2591_v8  ;;  %v2574_v58 = vcombine.high %v2566_v6, %v3744_v17  ;;  %v2575_v51 = vcombine.high %v2573_v13, %v3744_v17 }
 0x875   : > { %v2614_v52 = vshrl.u32 %v2566_v6, 16  ;;  %v2630_v10 = vshrl.u32 %v2573_v13, 16 }
 0x876   : > { %v2600_v14 = vrot.slane %v2592_v62, %v4217_v40  ;;  %v2607_v48 = vrot.slane %v2593_v3, %v4217_v40  ;;  %v2622_v57 = vshrl.u32 %v2574_v58, 16  ;;  %v2638_v23 = vshrl.u32 %v2575_v51, 16 }
 0x878   : > { %v2608_v53 = vcombine.high %v2600_v14, %v3744_v17  ;;  %v2609_v42 = vcombine.high %v2607_v48, %v3744_v17  ;;  %v2612_v56 = vpack.i.b16 %v2600_v14, %v2566_v6  ;;  %v2615_v33 = vshrl.u32 %v2600_v14, 16 }
 0x879   : > { %v2628_v60 = vpack.i.b16 %v2607_v48, %v2573_v13  ;;  %v2631_v61 = vshrl.u32 %v2607_v48, 16 }
 0x87a   : > { %v2616_v0 = vpack.i.b16 %v2615_v33, %v2614_v52  ;;  %v2620_v7 = vpack.i.b16 %v2608_v53, %v2574_v58  ;;  %v2623_v37 = vshrl.u32 %v2608_v53, 16  ;;  %v2636_v21 = vpack.i.b16 %v2609_v42, %v2575_v51 }
 0x87b   : > { %v2632_v24 = vpack.i.b16 %v2631_v61, %v2630_v10  ;;  %v2639_v25 = vshrl.u32 %v2609_v42, 16  ;;  %v2642_v26 = vcombine.low %v2612_v56, %v2628_v60 }
 0x87c   : > { %v2624_v28 = vpack.i.b16 %v2623_v37, %v2622_v57  ;;  %v2650_v41 = vcombine.low %v2620_v7, %v2636_v21 }
 0x87d   : > { %v2640_v29 = vpack.i.b16 %v2639_v25, %v2638_v23  ;;  %v2667_v31 = vcombine.low %v2616_v0, %v2632_v24  ;;  %v2649_v46 = vrot.slane %v2642_v26, %v4214_v36 }
 0x87e   : > { %v2657_v35 = vrot.slane %v2650_v41, %v4214_v36 }
 0x87f   : > { %v2675_v39 = vcombine.low %v2624_v28, %v2640_v29  ;;  %v2674_v50 = vrot.slane %v2667_v31, %v4214_v36 }
 0x880   : > { %v2658_v43 = vcombine.low %v2649_v46, %v2657_v35 }
 0x881   : > { %v2682_v44 = vrot.slane %v2675_v39, %v4214_v36 }
 0x882   : > { %v2665_v9 = vrot.slane %v2658_v43, %v4217_v40 }
 0x883   : > { %v2683_v45 = vcombine.low %v2674_v50, %v2682_v44 }
 0x884   : > { %v2695_v22 = vshrl.u32 %v2665_v9, 16  ;;  %v2666_v27 = vcombine.high %v2665_v9, %v3744_v17 }
 0x885   : > { %v2690_v47 = vrot.slane %v2683_v45, %v4217_v40 }
 0x886   : > { %v2701_v36 = vshrl.u32 %v2666_v27, 16 }
 0x887   : > { %v2696_v49 = vshrl.u32 %v2690_v47, 16  ;;  %v2691_v38 = vcombine.high %v2690_v47, %v3744_v17  ;;  %v2694_v54 = vpack.i.b16 %v2690_v47, %v2665_v9 }
 0x889   : > { %v2697_v59 = vpack.i.b16 %v2696_v49, %v2695_v22  ;;  %v2700_v2 = vpack.i.b16 %v2691_v38, %v2666_v27  ;;  %v2702_v12 = vshrl.u32 %v2691_v38, 16 }
 0x88b   : > { %2704 = vrot.lane.b32.xlu1 %v2697_v59, %s3751_s3  ;;  %2706 = vrot.lane.b32.xlu0 %v2700_v2, %s3752_s16  ;;  %v2703_v30 = vpack.i.b16 %v2702_v12, %v2701_v36 }
 0x88f   : > { %2708 = vrot.lane.b32.xlu1 %v2703_v30, %s3753_s21 }
 0x8fd   : > { %v2705_v40 = vpop.permute.xlu1 %2704  ;;  %v2707_v17 = vpop.permute.xlu0 %2706 }
 0x8fe   : > { %v2712_v16 = vsel %vm1488_vm5, %v2694_v54, %v2705_v40 }
 0x8ff   : > { %v2715_v18 = vsel %vm2713_vm8, %v2712_v16, %v2707_v17 }
 0x901   : > { %v2709_v19 = vpop.permute.xlu1 %2708 }
 0x902   : > { %v2718_v20 = vsel %vm2716_vm9, %v2715_v18, %v2709_v19 }
 0x903   : > { %3204 = vmatmul.mubr.msk.bf16.vlgmr.msra.gmra.mxu1 %vm1266_vm4, %v2718_v20 }
 0x9c3   : > { %v2778_v15 = vpop.f32.mrf.mxu1 }
 0x9c4   : > { %v2779_v4 = vadd.f32 %v3025_v55, %v2778_v15 }
 0x9c5   : > { %v3205_v63 = vpop.f32.mrf.mxu1 }
 0x9c6   : > { %v2784_v1 = vpack.c.bf16 %v2779_v4, %v2779_v4 }
 0x9c7   : > { %v2781_v34 = vpop.f32.mrf.mxu1 }
 0x9c8   : > { %2786 = vst.msk [vmem:[%s4074_s6] sm:$0xf] %vm2785_vm10, %v2784_v1 }
 0x9c9   : > { %v3206_v5 = vpop.f32.mrf.mxu1 }
 0x9ca   : > { %3601 = shalt.err (!%p3598_p3)
}
 0x9cb   : > { %s3602_s6 = scalar_lea.hbm %s4551_s18, 64  ;;  %s3606_s3 = scalar_lea.hbm %s4683_s4, 256 }
 0x9cc   : > { %p3603_p7 = scmp.ne.s32.totalorder %s4551_s18, %s3602_s6  ;;  %p3607_p0 = scmp.lt.s32.totalorder %s4551_s18, %s4683_s4 }
 0x9cd   : > { %p3608_p5 = scmp.lt.s32.totalorder %s3606_s3, %s3602_s6 }
 0x9ce   : > { %p3604_p9 = pnand %p3603_p7, %p4684_p10 }
 0x9cf   : > { %p3609_p6 = por %p3608_p5, %p3607_p0 }
 0x9d0   : > { %p3605_p8 = pneg %p3604_p9 }
 0x9d2   : > { %p3610_p1 = pnand %p3609_p6, %p3605_p8 }
 0x9d4   : > { %3613 = shalt.err (!%p3610_p1)
}
 0x9d5   : > { %3227 = dma.vmem_to_hbm [thread:$0]  (%p4684_p10), %s4553_s26, 64, %s4551_s18, %s2788_s19  }
 0x9d6 PF: > { %s4685_s21 = sld [smem:[#allocation26_spill]]  ;;  %p3262_p13 = scmp.ge.s32.totalorder %s3724_s23, 2 }
 0x9d7   : > { %s4686_s25 = sld [smem:[#allocation34_spill]] }
 0x9dc   : > { %s2815_s20 = sand.u32 1, %s4685_s21  }
 0x9dd   : > { %p4687_p2 = scmp.ne.s32.totalorder %s4686_s25, 0  ;;  %s2816_s10 = scalar_lea.sflag [#allocation9], %s2815_s20 }
 0x9df   : > { %p3250_p11 = pnand %p3262_p13, %p4687_p2 }
 0x9e1   : > { %p3251_p4 = pneg %p3250_p11 }
 0x9e3   : > { %3679 = dma.done.wait (%p3251_p4), %s2816_s10, 64  }
 0x9e4   : > { %3681 = vsyncadd (%p3251_p4), %s2816_s10, 4294967232  ;;  %s31_s23 = sadd.s32 1, %s3724_s23   ;;  %s4688_s24 = sld [smem:[#allocation25_spill]] }
 0x9e5   : > { %p28_p12 = scmp.ge.s32.totalorder %s31_s23, 6   ;;  %s4689_s15 = sld [smem:[#allocation32_spill]] }
 0x9e6   : > { %s4690_s12 = sld [smem:[#allocation27_spill]]  ;;  %s4695_s13 = smov %s3688_s14 }
 0x9e7   : > { %s4691_s18 = sld [smem:[#allocation33_spill]]  ;;  %s4697_s16 = smov %s3700_s17 }
 0x9e8   : > { %s4692_s19 = sld [smem:[#allocation29_spill]]  ;;  %s4699_s20 = smov %s3720_s22 }
 0x9e9   : > { %s4693_s21 = sld [smem:[#allocation30_spill]] }
 0x9ea   : > { %s4694_s29 = sld [smem:[#allocation31_spill]]  ;;  %s4696_s14 = smov %s4688_s24 }
 0x9ec   : > { %s4698_s17 = smov %s4690_s12  ;;  %30 = sbr.rel (!%p28_p12) target bundleno = 22 (0x16), region = 138 }
 0x9f0   : > { %s4700_s22 = smov %s4694_s29 }
 0x9f1   :  { %2821 = vsyncpa [#allocation8], 1 }
 0x9f2   :  { %2823 = vsyncpa [#allocation8 + $0x1], 1 }
 0x9f3   :  { %2824 = vsyncpa [#allocation11], 1 }
 0x9f4   :  { %2826 = vsyncpa [#allocation11 + $0x1], 1 }
 0x9f5   :  { %2827 = vsyncpa [#allocation14], 1 }
 0x9f6   :  { %2828 = vsyncpa [#allocation17], 1 }
 0x9f7   :  { %2829 = vsyncpa [#allocation9], 1 }
 0x9f8   :  { %2831 = vsyncpa [#allocation9 + $0x1], 1 }

</bundles_post_ra>
